<compile_context>
chip_gen: v7x
topology: tpu7x:2x2x1
jax: 0.10.0
libtpu: 0.0.40
codegen_flags: <defaults>
</compile_context>

<pallas_src>
import math
import functools

import jax
import jax.numpy as jnp
from jax import lax
from jax.experimental import pallas as pl
from jax.experimental.pallas import tpu as pltpu

NEG_SLOPE = 0.2          # matches F.leaky_relu(output, 0.2) in the reference
BN_EPS = 1e-5


# ----------------------------------------------------------------------------
# Kernel: full DDNet forward for ONE sample (grid step = one batch element).
# ----------------------------------------------------------------------------
def _ddnet_kernel(m_ref, p_ref, w_ref, o_ref, scr, *, offsets):
    f32 = jnp.float32

    def Wv(name):
        off, r, c = offsets[name]
        return w_ref[off:off + r, 0:c]

    def mxdot(a, b):
        # bf16 MXU operands, f32 accumulate (perf-review item for v5e/v6e).
        return jnp.dot(a.astype(jnp.bfloat16), b.astype(jnp.bfloat16),
                       preferred_element_type=f32)

    def lrelu(v):
        return jnp.where(v >= 0, v, NEG_SLOPE * v)

    def shift_down(y):
        # out[t] = y[t-1], out[0] = 0  (prev-frame tap of a 'same' K=3 conv)
        rows = y.shape[0]
        if rows % 8 == 0:
            idx = lax.broadcasted_iota(jnp.int32, (rows, 1), 0)
            return jnp.where(idx != 0, pltpu.roll(y, 1, axis=0), 0.0)
        # tiny frame counts: negligible (rows x rows) select matmul fallback
        i = lax.broadcasted_iota(jnp.int32, (rows, rows), 0)
        j = lax.broadcasted_iota(jnp.int32, (rows, rows), 1)
        sel = (j == i - 1).astype(f32)
        return jnp.dot(sel, y, preferred_element_type=f32)

    def shift_up(y):
        # out[t] = y[t+1], out[rows-1] = 0  (next-frame tap)
        rows = y.shape[0]
        if rows % 8 == 0:
            idx = lax.broadcasted_iota(jnp.int32, (rows, 1), 0)
            return jnp.where(idx != rows - 1,
                             pltpu.roll(y, rows - 1, axis=0), 0.0)
        i = lax.broadcasted_iota(jnp.int32, (rows, rows), 0)
        j = lax.broadcasted_iota(jnp.int32, (rows, rows), 1)
        sel = (j == i + 1).astype(f32)
        return jnp.dot(sel, y, preferred_element_type=f32)

    def conv_k1(x, name):
        off, r, cout = offsets[name]
        return lrelu(mxdot(x, w_ref[off:off + r, 0:cout]))

    def conv_k3(x, name):
        # Three (Cin, Cout) tap matmuls; shift via roll+mask, no lane concat.
        cin = x.shape[1]
        off, _, cout = offsets[name]
        wp = w_ref[off:off + cin, 0:cout]
        wc = w_ref[off + cin:off + 2 * cin, 0:cout]
        wn = w_ref[off + 2 * cin:off + 3 * cin, 0:cout]
        y = mxdot(x, wc) + shift_down(mxdot(x, wp)) + shift_up(mxdot(x, wn))
        return lrelu(y)

    def pool2(x):
        # MaxPool1d(kernel=2) over frames: strided sublane reads, no matmul.
        rows, c = x.shape
        scr[0:rows, 0:c] = x
        even = scr[pl.ds(0, rows // 2, 2), pl.ds(0, c)]
        odd = scr[pl.ds(1, rows // 2, 2), pl.ds(0, c)]
        return jnp.maximum(even, odd)

    m = m_ref[...]            # (T, feat_d)
    p = p_ref[...]            # (T, joint_n * joint_d)

    # --- JCD branch ---------------------------------------------------------
    x = conv_k1(m, "jcd1")
    x = conv_k3(x, "jcd2")
    x = conv_k1(x, "jcd3")
    x = pool2(x)                                   # (T/2, f)

    # --- poses_motion: frame diff + bilinear resize as per-sample linear
    #     maps on the frame axis (kept in f32 to preserve the small diffs) ---
    d_slow = jnp.dot(Wv("a_slow"), p, preferred_element_type=f32)   # (T,   JD)
    d_fast = jnp.dot(Wv("a_fast"), p, preferred_element_type=f32)   # (T/2, JD)

    # --- slow-motion branch --------------------------------------------------
    xs = conv_k1(d_slow, "slow1")
    xs = conv_k3(xs, "slow2")
    xs = conv_k1(xs, "slow3")
    xs = pool2(xs)                                 # (T/2, f)

    # --- fast-motion branch --------------------------------------------------
    xf = conv_k1(d_fast, "fast1")
    xf = conv_k3(xf, "fast2")
    xf = conv_k1(xf, "fast3")                      # (T/2, f)

    # --- fuse + blocks --------------------------------------------------------
    x = jnp.concatenate([x, xs, xf], axis=1)       # (T/2, 3f)
    x = conv_k3(x, "b1a")
    x = conv_k3(x, "b1b")
    x = pool2(x)                                   # (T/4, 2f)
    x = conv_k3(x, "b2a")
    x = conv_k3(x, "b2b")
    x = pool2(x)                                   # (T/8, 4f)
    x = conv_k3(x, "b3a")
    x = conv_k3(x, "b3b")                          # (T/8, 8f)

    # --- head -----------------------------------------------------------------
    xm = jnp.max(x, axis=0, keepdims=True)         # frame max -> (1, 8f)
    h = lrelu(mxdot(xm, Wv("fc1_w")) + Wv("fc1_b"))
    h = lrelu(mxdot(h, Wv("fc2_w")) + Wv("fc2_b"))
    o_ref[...] = mxdot(h, Wv("fc3_w")) + Wv("fc3_b")


# ----------------------------------------------------------------------------
# Wrapper: grid over the batch, weights resident, explicit specs.
# ----------------------------------------------------------------------------
def ddnet_forward(wpack, offsets, M, P):
    B, T, feat_d = M.shape
    _, _, J, D = P.shape
    assert T % 8 == 0, "frame_l must be divisible by 8 (three MaxPool1d(2))"
    P2 = P.reshape(B, T, J * D)
    filters = offsets["jcd3"][2]
    class_num = offsets["fc3_b"][2]

    kernel = functools.partial(_ddnet_kernel, offsets=offsets)
    out = pl.pallas_call(
        kernel,
        grid=(B,),
        in_specs=[
            pl.BlockSpec((None, T, feat_d), lambda b: (b, 0, 0)),
            pl.BlockSpec((None, T, J * D), lambda b: (b, 0, 0)),
            pl.BlockSpec(wpack.shape, lambda b: (0, 0)),    # resident weights
        ],
        out_specs=pl.BlockSpec((None, 1, class_num), lambda b: (b, 0, 0)),
        out_shape=jax.ShapeDtypeStruct((B, 1, class_num), jnp.float32),
        scratch_shapes=[pltpu.VMEM((T, 8 * filters), jnp.float32)],
        compiler_params=pltpu.CompilerParams(
            dimension_semantics=("parallel",),
            vmem_limit_bytes=32 * 1024 * 1024),
    )(M, P2, wpack)
    return out.reshape(B, class_num)


# ----------------------------------------------------------------------------
# Parameters: deterministic synthetic weights, eval-mode BN folded in,
# everything packed into one (rows, 128) operand + static offset table.
# ----------------------------------------------------------------------------
def init_params(frame_l, joint_n, joint_d, feat_d, filters, class_num, key):
    inv = 1.0 / math.sqrt(1.0 + BN_EPS)   # eval-mode BN (fresh running stats)
    f = filters
    jd = joint_n * joint_d
    keys = iter(jax.random.split(key, 18))

    entries = []

    def add_conv(name, cin, cout, k):
        w = 0.1 * jax.random.normal(next(keys), (k, cin, cout), jnp.float32)
        entries.append((name, (w * inv).reshape(k * cin, cout)))

    def add_linear(name, cin, cout, fold_bn):
        w = 0.1 * jax.random.normal(next(keys), (cin, cout), jnp.float32)
        if fold_bn:
            w = w * inv
        entries.append((name + "_w", w))
        entries.append((name + "_b", jnp.zeros((1, cout), jnp.float32)))

    add_conv("jcd1", feat_d, 2 * f, 1)
    add_conv("jcd2", 2 * f, f, 3)
    add_conv("jcd3", f, f, 1)
    add_conv("slow1", jd, 2 * f, 1)
    add_conv("slow2", 2 * f, f, 3)
    add_conv("slow3", f, f, 1)
    add_conv("fast1", jd, 2 * f, 1)
    add_conv("fast2", 2 * f, f, 3)
    add_conv("fast3", f, f, 1)
    add_conv("b1a", 3 * f, 2 * f, 3)
    add_conv("b1b", 2 * f, 2 * f, 3)
    add_conv("b2a", 2 * f, 4 * f, 3)
    add_conv("b2b", 4 * f, 4 * f, 3)
    add_conv("b3a", 4 * f, 8 * f, 3)
    add_conv("b3b", 8 * f, 8 * f, 3)
    add_linear("fc1", 8 * f, 128, True)
    add_linear("fc2", 128, 128, True)
    add_linear("fc3", 128, class_num, False)

    # poses_motion = frame diff + bilinear resize back to the frame count;
    # both are linear along the frame axis so they collapse to one per-sample
    # matrix each (a_slow: (T,T), a_fast: (T/2,T)).
    # TODO(synk): matches jax.image.resize bilinear (align_corners=False);
    # verify against the exact F.interpolate settings of the reference repo.
    T = frame_l
    eye_t = jnp.eye(T, dtype=jnp.float32)
    d_slow = eye_t[1:] - eye_t[:-1]                                    # (T-1, T)
    r_slow = jax.image.resize(jnp.eye(T - 1, dtype=jnp.float32),
                              (T, T - 1), method="bilinear")           # (T, T-1)
    entries.append(("a_slow", r_slow @ d_slow))                        # (T, T)

    tf = T // 2
    sel_even = eye_t[0::2]                                             # (T/2, T)
    eye_f = jnp.eye(tf, dtype=jnp.float32)
    d_fast = eye_f[1:] - eye_f[:-1]                                    # (T/2-1, T/2)
    r_fast = jax.image.resize(jnp.eye(tf - 1, dtype=jnp.float32),
                              (tf, tf - 1), method="bilinear")         # (T/2, T/2-1)
    entries.append(("a_fast", r_fast @ d_fast @ sel_even))             # (T/2, T)

    # Pack everything into one (rows, 128) f32 operand; every block starts on
    # an 8-row (sublane tile) boundary and is read with static slices.
    LANE = 128
    offsets = {}
    blocks = []
    row = 0
    for name, arr in entries:
        r, c = arr.shape
        assert c <= LANE
        rp = -(-r // 8) * 8
        blk = jnp.zeros((rp, LANE), jnp.float32).at[:r, :c].set(arr)
        blocks.append(blk)
        offsets[name] = (row, r, c)
        row += rp
    wpack = jnp.concatenate(blocks, axis=0)
    return wpack, offsets


if __name__ == "__main__":
    frame_l, joint_n, joint_d = 16, 4, 3
    filters, class_num = 8, 5
    feat_d = joint_n * (joint_n - 1) // 2      # JCD feature dimension = 6
    B = 2

    key = jax.random.PRNGKey(0)
    kM, kP, kW = jax.random.split(key, 3)
    M = jax.random.normal(kM, (B, frame_l, feat_d), jnp.float32)
    P = jax.random.normal(kP, (B, frame_l, joint_n, joint_d), jnp.float32)

    wpack, offsets = init_params(frame_l, joint_n, joint_d, feat_d, filters,
                                 class_num, kW)

    out = ddnet_forward(wpack, offsets, M, P)
    out = jax.block_until_ready(out)
    assert out.shape == (B, class_num) and out.dtype == jnp.float32
    print("KERNEL_OK")
</pallas_src>

<mosaic_0001>
module attributes {stable_mosaic.version = 11 : i64} {
  func.func @_ddnet_kernel(%arg0: i32, %arg1: memref<1x16x6xf32, #tpu.memory_space<vmem>>, %arg2: memref<1x16x12xf32, #tpu.memory_space<vmem>>, %arg3: memref<1128x128xf32, #tpu.memory_space<vmem>>, %arg4: memref<1x1x5xf32, #tpu.memory_space<vmem>>, %arg5: memref<16x64xf32, #tpu.memory_space<vmem>>) attributes {dimension_semantics = [#tpu.dimension_semantics<parallel>], iteration_bounds = array<i64: 2>, scalar_prefetch = 0 : i64, scratch_operands = 1 : i64, tpu.core_type = #tpu.core_type<tc>, window_params = [{transform_indices = @transform_0, window_bounds = array<i64: 1, 16, 6>}, {transform_indices = @transform_1, window_bounds = array<i64: 1, 16, 12>}, {pipeline_mode = #tpu.pipeline_mode<synchronous>, transform_indices = @transform_2, window_bounds = array<i64: 1128, 128>}, {transform_indices = @transform_3, window_bounds = array<i64: 1, 1, 5>}]} {
    %c0 = arith.constant 0 : index
    %c0_0 = arith.constant 0 : index
    %c0_1 = arith.constant 0 : index
    %0 = vector.load %arg1[%c0, %c0_0, %c0_1] : memref<1x16x6xf32, #tpu.memory_space<vmem>>, vector<1x16x6xf32>
    %1 = vector.shape_cast %0 : vector<1x16x6xf32> to vector<16x6xf32>
    %c0_2 = arith.constant 0 : index
    %c0_3 = arith.constant 0 : index
    %c0_4 = arith.constant 0 : index
    %2 = vector.load %arg2[%c0_2, %c0_3, %c0_4] : memref<1x16x12xf32, #tpu.memory_space<vmem>>, vector<1x16x12xf32>
    %3 = vector.shape_cast %2 : vector<1x16x12xf32> to vector<16x12xf32>
    %c0_5 = arith.constant 0 : index
    %c0_6 = arith.constant 0 : index
    %4 = vector.load %arg3[%c0_5, %c0_6] : memref<1128x128xf32, #tpu.memory_space<vmem>>, vector<6x16xf32>
    %5 = arith.truncf %1 : vector<16x6xf32> to vector<16x6xbf16>
    %6 = arith.truncf %4 : vector<6x16xf32> to vector<6x16xbf16>
    %cst = arith.constant dense<0.000000e+00> : vector<16x16xf32>
    %7 = tpu.matmul %5, %6, %cst {dimension_numbers = #tpu.dot_dimension_numbers<[1], [0], [0], [1], [0, 0, 1, 1], [], []>} : vector<16x6xbf16>, vector<6x16xbf16>, vector<16x16xf32> -> vector<16x16xf32>
    %cst_7 = arith.constant 0.000000e+00 : f32
    %8 = vector.broadcast %cst_7 : f32 to vector<16x16xf32>
    %9 = arith.cmpf oge, %7, %8 : vector<16x16xf32>
    %cst_8 = arith.constant 2.000000e-01 : f32
    %10 = vector.broadcast %cst_8 : f32 to vector<16x16xf32>
    %11 = arith.mulf %10, %7 : vector<16x16xf32>
    %12 = arith.select %9, %7, %11 : vector<16x16xi1>, vector<16x16xf32>
    %c8 = arith.constant 8 : index
    %c0_9 = arith.constant 0 : index
    %13 = vector.load %arg3[%c8, %c0_9] : memref<1128x128xf32, #tpu.memory_space<vmem>>, vector<16x8xf32>
    %c24 = arith.constant 24 : index
    %c0_10 = arith.constant 0 : index
    %14 = vector.load %arg3[%c24, %c0_10] : memref<1128x128xf32, #tpu.memory_space<vmem>>, vector<16x8xf32>
    %c40 = arith.constant 40 : index
    %c0_11 = arith.constant 0 : index
    %15 = vector.load %arg3[%c40, %c0_11] : memref<1128x128xf32, #tpu.memory_space<vmem>>, vector<16x8xf32>
    %16 = arith.truncf %12 : vector<16x16xf32> to vector<16x16xbf16>
    %17 = arith.truncf %14 : vector<16x8xf32> to vector<16x8xbf16>
    %cst_12 = arith.constant dense<0.000000e+00> : vector<16x8xf32>
    %18 = tpu.matmul %16, %17, %cst_12 {dimension_numbers = #tpu.dot_dimension_numbers<[1], [0], [0], [1], [0, 0, 1, 1], [], []>} : vector<16x16xbf16>, vector<16x8xbf16>, vector<16x8xf32> -> vector<16x8xf32>
    %19 = arith.truncf %12 : vector<16x16xf32> to vector<16x16xbf16>
    %20 = arith.truncf %13 : vector<16x8xf32> to vector<16x8xbf16>
    %cst_13 = arith.constant dense<0.000000e+00> : vector<16x8xf32>
    %21 = tpu.matmul %19, %20, %cst_13 {dimension_numbers = #tpu.dot_dimension_numbers<[1], [0], [0], [1], [0, 0, 1, 1], [], []>} : vector<16x16xbf16>, vector<16x8xbf16>, vector<16x8xf32> -> vector<16x8xf32>
    %22 = tpu.iota {dimensions = array<i32: 0>} : vector<16x1xi32>
    %c0_i32 = arith.constant 0 : i32
    %23 = vector.broadcast %c0_i32 : i32 to vector<16x1xi32>
    %24 = arith.cmpi ne, %22, %23 : vector<16x1xi32>
    %c1_i32 = arith.constant 1 : i32
    %25 = tpu.dynamic_rotate %21 by %c1_i32 dim 0 : vector<16x8xf32>, i32 -> vector<16x8xf32>
    %cst_14 = arith.constant 0.000000e+00 : f32
    %26 = vector.shape_cast %24 : vector<16x1xi1> to vector<16x1xi1>
    %27 = vector.broadcast %26 : vector<16x1xi1> to vector<16x8xi1>
    %28 = vector.broadcast %cst_14 : f32 to vector<16x8xf32>
    %29 = arith.select %27, %25, %28 : vector<16x8xi1>, vector<16x8xf32>
    %30 = arith.addf %18, %29 : vector<16x8xf32>
    %31 = arith.truncf %12 : vector<16x16xf32> to vector<16x16xbf16>
    %32 = arith.truncf %15 : vector<16x8xf32> to vector<16x8xbf16>
    %cst_15 = arith.constant dense<0.000000e+00> : vector<16x8xf32>
    %33 = tpu.matmul %31, %32, %cst_15 {dimension_numbers = #tpu.dot_dimension_numbers<[1], [0], [0], [1], [0, 0, 1, 1], [], []>} : vector<16x16xbf16>, vector<16x8xbf16>, vector<16x8xf32> -> vector<16x8xf32>
    %34 = tpu.iota {dimensions = array<i32: 0>} : vector<16x1xi32>
    %c15_i32 = arith.constant 15 : i32
    %35 = vector.broadcast %c15_i32 : i32 to vector<16x1xi32>
    %36 = arith.cmpi ne, %34, %35 : vector<16x1xi32>
    %c15_i32_16 = arith.constant 15 : i32
    %37 = tpu.dynamic_rotate %33 by %c15_i32_16 dim 0 : vector<16x8xf32>, i32 -> vector<16x8xf32>
    %cst_17 = arith.constant 0.000000e+00 : f32
    %38 = vector.shape_cast %36 : vector<16x1xi1> to vector<16x1xi1>
    %39 = vector.broadcast %38 : vector<16x1xi1> to vector<16x8xi1>
    %40 = vector.broadcast %cst_17 : f32 to vector<16x8xf32>
    %41 = arith.select %39, %37, %40 : vector<16x8xi1>, vector<16x8xf32>
    %42 = arith.addf %30, %41 : vector<16x8xf32>
    %cst_18 = arith.constant 0.000000e+00 : f32
    %43 = vector.broadcast %cst_18 : f32 to vector<16x8xf32>
    %44 = arith.cmpf oge, %42, %43 : vector<16x8xf32>
    %cst_19 = arith.constant 2.000000e-01 : f32
    %45 = vector.broadcast %cst_19 : f32 to vector<16x8xf32>
    %46 = arith.mulf %45, %42 : vector<16x8xf32>
    %47 = arith.select %44, %42, %46 : vector<16x8xi1>, vector<16x8xf32>
    %c56 = arith.constant 56 : index
    %c0_20 = arith.constant 0 : index
    %48 = vector.load %arg3[%c56, %c0_20] : memref<1128x128xf32, #tpu.memory_space<vmem>>, vector<8x8xf32>
    %49 = arith.truncf %47 : vector<16x8xf32> to vector<16x8xbf16>
    %50 = arith.truncf %48 : vector<8x8xf32> to vector<8x8xbf16>
    %cst_21 = arith.constant dense<0.000000e+00> : vector<16x8xf32>
    %51 = tpu.matmul %49, %50, %cst_21 {dimension_numbers = #tpu.dot_dimension_numbers<[1], [0], [0], [1], [0, 0, 1, 1], [], []>} : vector<16x8xbf16>, vector<8x8xbf16>, vector<16x8xf32> -> vector<16x8xf32>
    %cst_22 = arith.constant 0.000000e+00 : f32
    %52 = vector.broadcast %cst_22 : f32 to vector<16x8xf32>
    %53 = arith.cmpf oge, %51, %52 : vector<16x8xf32>
    %cst_23 = arith.constant 2.000000e-01 : f32
    %54 = vector.broadcast %cst_23 : f32 to vector<16x8xf32>
    %55 = arith.mulf %54, %51 : vector<16x8xf32>
    %56 = arith.select %53, %51, %55 : vector<16x8xi1>, vector<16x8xf32>
    %c0_24 = arith.constant 0 : index
    %c0_25 = arith.constant 0 : index
    %57 = vector.load %arg5[%c0_24, %c0_25] : memref<16x64xf32, #tpu.memory_space<vmem>>, vector<16x8xf32>
    tpu.vector_store %arg5[%c0_24, %c0_25], %56 {strides = array<i32>} : memref<16x64xf32, #tpu.memory_space<vmem>>, vector<16x8xf32>,
    %c0_26 = arith.constant 0 : index
    %c0_27 = arith.constant 0 : index
    %58 = tpu.strided_load %arg5[%c0_26, %c0_27] {strides = array<i32: 2, 1>} : memref<16x64xf32, #tpu.memory_space<vmem>>, vector<8x8xf32>
    %c1 = arith.constant 1 : index
    %c0_28 = arith.constant 0 : index
    %59 = tpu.strided_load %arg5[%c1, %c0_28] {strides = array<i32: 2, 1>} : memref<16x64xf32, #tpu.memory_space<vmem>>, vector<8x8xf32>
    %60 = arith.maximumf %58, %59 : vector<8x8xf32>
    %c1104 = arith.constant 1104 : index
    %c0_29 = arith.constant 0 : index
    %61 = vector.load %arg3[%c1104, %c0_29] : memref<1128x128xf32, #tpu.memory_space<vmem>>, vector<16x16xf32>
    %cst_30 = arith.constant dense<0.000000e+00> : vector<16x12xf32>
    %62 = tpu.matmul %61, %3, %cst_30 {dimension_numbers = #tpu.dot_dimension_numbers<[1], [0], [0], [1], [0, 0, 1, 1], [], []>} : vector<16x16xf32>, vector<16x12xf32>, vector<16x12xf32> -> vector<16x12xf32>
    %c1120 = arith.constant 1120 : index
    %c0_31 = arith.constant 0 : index
    %63 = vector.load %arg3[%c1120, %c0_31] : memref<1128x128xf32, #tpu.memory_space<vmem>>, vector<8x16xf32>
    %cst_32 = arith.constant dense<0.000000e+00> : vector<8x12xf32>
    %64 = tpu.matmul %63, %3, %cst_32 {dimension_numbers = #tpu.dot_dimension_numbers<[1], [0], [0], [1], [0, 0, 1, 1], [], []>} : vector<8x16xf32>, vector<16x12xf32>, vector<8x12xf32> -> vector<8x12xf32>
    %c64 = arith.constant 64 : index
    %c0_33 = arith.constant 0 : index
    %65 = vector.load %arg3[%c64, %c0_33] : memref<1128x128xf32, #tpu.memory_space<vmem>>, vector<12x16xf32>
    %66 = arith.truncf %62 : vector<16x12xf32> to vector<16x12xbf16>
    %67 = arith.truncf %65 : vector<12x16xf32> to vector<12x16xbf16>
    %cst_34 = arith.constant dense<0.000000e+00> : vector<16x16xf32>
    %68 = tpu.matmul %66, %67, %cst_34 {dimension_numbers = #tpu.dot_dimension_numbers<[1], [0], [0], [1], [0, 0, 1, 1], [], []>} : vector<16x12xbf16>, vector<12x16xbf16>, vector<16x16xf32> -> vector<16x16xf32>
    %cst_35 = arith.constant 0.000000e+00 : f32
    %69 = vector.broadcast %cst_35 : f32 to vector<16x16xf32>
    %70 = arith.cmpf oge, %68, %69 : vector<16x16xf32>
    %cst_36 = arith.constant 2.000000e-01 : f32
    %71 = vector.broadcast %cst_36 : f32 to vector<16x16xf32>
    %72 = arith.mulf %71, %68 : vector<16x16xf32>
    %73 = arith.select %70, %68, %72 : vector<16x16xi1>, vector<16x16xf32>
    %c80 = arith.constant 80 : index
    %c0_37 = arith.constant 0 : index
    %74 = vector.load %arg3[%c80, %c0_37] : memref<1128x128xf32, #tpu.memory_space<vmem>>, vector<16x8xf32>
    %c96 = arith.constant 96 : index
    %c0_38 = arith.constant 0 : index
    %75 = vector.load %arg3[%c96, %c0_38] : memref<1128x128xf32, #tpu.memory_space<vmem>>, vector<16x8xf32>
    %c112 = arith.constant 112 : index
    %c0_39 = arith.constant 0 : index
    %76 = vector.load %arg3[%c112, %c0_39] : memref<1128x128xf32, #tpu.memory_space<vmem>>, vector<16x8xf32>
    %77 = arith.truncf %73 : vector<16x16xf32> to vector<16x16xbf16>
    %78 = arith.truncf %75 : vector<16x8xf32> to vector<16x8xbf16>
    %cst_40 = arith.constant dense<0.000000e+00> : vector<16x8xf32>
    %79 = tpu.matmul %77, %78, %cst_40 {dimension_numbers = #tpu.dot_dimension_numbers<[1], [0], [0], [1], [0, 0, 1, 1], [], []>} : vector<16x16xbf16>, vector<16x8xbf16>, vector<16x8xf32> -> vector<16x8xf32>
    %80 = arith.truncf %73 : vector<16x16xf32> to vector<16x16xbf16>
    %81 = arith.truncf %74 : vector<16x8xf32> to vector<16x8xbf16>
    %cst_41 = arith.constant dense<0.000000e+00> : vector<16x8xf32>
    %82 = tpu.matmul %80, %81, %cst_41 {dimension_numbers = #tpu.dot_dimension_numbers<[1], [0], [0], [1], [0, 0, 1, 1], [], []>} : vector<16x16xbf16>, vector<16x8xbf16>, vector<16x8xf32> -> vector<16x8xf32>
    %83 = tpu.iota {dimensions = array<i32: 0>} : vector<16x1xi32>
    %c0_i32_42 = arith.constant 0 : i32
    %84 = vector.broadcast %c0_i32_42 : i32 to vector<16x1xi32>
    %85 = arith.cmpi ne, %83, %84 : vector<16x1xi32>
    %c1_i32_43 = arith.constant 1 : i32
    %86 = tpu.dynamic_rotate %82 by %c1_i32_43 dim 0 : vector<16x8xf32>, i32 -> vector<16x8xf32>
    %cst_44 = arith.constant 0.000000e+00 : f32
    %87 = vector.shape_cast %85 : vector<16x1xi1> to vector<16x1xi1>
    %88 = vector.broadcast %87 : vector<16x1xi1> to vector<16x8xi1>
    %89 = vector.broadcast %cst_44 : f32 to vector<16x8xf32>
    %90 = arith.select %88, %86, %89 : vector<16x8xi1>, vector<16x8xf32>
    %91 = arith.addf %79, %90 : vector<16x8xf32>
    %92 = arith.truncf %73 : vector<16x16xf32> to vector<16x16xbf16>
    %93 = arith.truncf %76 : vector<16x8xf32> to vector<16x8xbf16>
    %cst_45 = arith.constant dense<0.000000e+00> : vector<16x8xf32>
    %94 = tpu.matmul %92, %93, %cst_45 {dimension_numbers = #tpu.dot_dimension_numbers<[1], [0], [0], [1], [0, 0, 1, 1], [], []>} : vector<16x16xbf16>, vector<16x8xbf16>, vector<16x8xf32> -> vector<16x8xf32>
    %95 = tpu.iota {dimensions = array<i32: 0>} : vector<16x1xi32>
    %c15_i32_46 = arith.constant 15 : i32
    %96 = vector.broadcast %c15_i32_46 : i32 to vector<16x1xi32>
    %97 = arith.cmpi ne, %95, %96 : vector<16x1xi32>
    %c15_i32_47 = arith.constant 15 : i32
    %98 = tpu.dynamic_rotate %94 by %c15_i32_47 dim 0 : vector<16x8xf32>, i32 -> vector<16x8xf32>
    %cst_48 = arith.constant 0.000000e+00 : f32
    %99 = vector.shape_cast %97 : vector<16x1xi1> to vector<16x1xi1>
    %100 = vector.broadcast %99 : vector<16x1xi1> to vector<16x8xi1>
    %101 = vector.broadcast %cst_48 : f32 to vector<16x8xf32>
    %102 = arith.select %100, %98, %101 : vector<16x8xi1>, vector<16x8xf32>
    %103 = arith.addf %91, %102 : vector<16x8xf32>
    %cst_49 = arith.constant 0.000000e+00 : f32
    %104 = vector.broadcast %cst_49 : f32 to vector<16x8xf32>
    %105 = arith.cmpf oge, %103, %104 : vector<16x8xf32>
    %cst_50 = arith.constant 2.000000e-01 : f32
    %106 = vector.broadcast %cst_50 : f32 to vector<16x8xf32>
    %107 = arith.mulf %106, %103 : vector<16x8xf32>
    %108 = arith.select %105, %103, %107 : vector<16x8xi1>, vector<16x8xf32>
    %c128 = arith.constant 128 : index
    %c0_51 = arith.constant 0 : index
    %109 = vector.load %arg3[%c128, %c0_51] : memref<1128x128xf32, #tpu.memory_space<vmem>>, vector<8x8xf32>
    %110 = arith.truncf %108 : vector<16x8xf32> to vector<16x8xbf16>
    %111 = arith.truncf %109 : vector<8x8xf32> to vector<8x8xbf16>
    %cst_52 = arith.constant dense<0.000000e+00> : vector<16x8xf32>
    %112 = tpu.matmul %110, %111, %cst_52 {dimension_numbers = #tpu.dot_dimension_numbers<[1], [0], [0], [1], [0, 0, 1, 1], [], []>} : vector<16x8xbf16>, vector<8x8xbf16>, vector<16x8xf32> -> vector<16x8xf32>
    %cst_53 = arith.constant 0.000000e+00 : f32
    %113 = vector.broadcast %cst_53 : f32 to vector<16x8xf32>
    %114 = arith.cmpf oge, %112, %113 : vector<16x8xf32>
    %cst_54 = arith.constant 2.000000e-01 : f32
    %115 = vector.broadcast %cst_54 : f32 to vector<16x8xf32>
    %116 = arith.mulf %115, %112 : vector<16x8xf32>
    %117 = arith.select %114, %112, %116 : vector<16x8xi1>, vector<16x8xf32>
    %c0_55 = arith.constant 0 : index
    %c0_56 = arith.constant 0 : index
    %118 = vector.load %arg5[%c0_55, %c0_56] : memref<16x64xf32, #tpu.memory_space<vmem>>, vector<16x8xf32>
    tpu.vector_store %arg5[%c0_55, %c0_56], %117 {strides = array<i32>} : memref<16x64xf32, #tpu.memory_space<vmem>>, vector<16x8xf32>,
    %c0_57 = arith.constant 0 : index
    %c0_58 = arith.constant 0 : index
    %119 = tpu.strided_load %arg5[%c0_57, %c0_58] {strides = array<i32: 2, 1>} : memref<16x64xf32, #tpu.memory_space<vmem>>, vector<8x8xf32>
    %c1_59 = arith.constant 1 : index
    %c0_60 = arith.constant 0 : index
    %120 = tpu.strided_load %arg5[%c1_59, %c0_60] {strides = array<i32: 2, 1>} : memref<16x64xf32, #tpu.memory_space<vmem>>, vector<8x8xf32>
    %121 = arith.maximumf %119, %120 : vector<8x8xf32>
    %c136 = arith.constant 136 : index
    %c0_61 = arith.constant 0 : index
    %122 = vector.load %arg3[%c136, %c0_61] : memref<1128x128xf32, #tpu.memory_space<vmem>>, vector<12x16xf32>
    %123 = arith.truncf %64 : vector<8x12xf32> to vector<8x12xbf16>
    %124 = arith.truncf %122 : vector<12x16xf32> to vector<12x16xbf16>
    %cst_62 = arith.constant dense<0.000000e+00> : vector<8x16xf32>
    %125 = tpu.matmul %123, %124, %cst_62 {dimension_numbers = #tpu.dot_dimension_numbers<[1], [0], [0], [1], [0, 0, 1, 1], [], []>} : vector<8x12xbf16>, vector<12x16xbf16>, vector<8x16xf32> -> vector<8x16xf32>
    %cst_63 = arith.constant 0.000000e+00 : f32
    %126 = vector.broadcast %cst_63 : f32 to vector<8x16xf32>
    %127 = arith.cmpf oge, %125, %126 : vector<8x16xf32>
    %cst_64 = arith.constant 2.000000e-01 : f32
    %128 = vector.broadcast %cst_64 : f32 to vector<8x16xf32>
    %129 = arith.mulf %128, %125 : vector<8x16xf32>
    %130 = arith.select %127, %125, %129 : vector<8x16xi1>, vector<8x16xf32>
    %c152 = arith.constant 152 : index
    %c0_65 = arith.constant 0 : index
    %131 = vector.load %arg3[%c152, %c0_65] : memref<1128x128xf32, #tpu.memory_space<vmem>>, vector<16x8xf32>
    %c168 = arith.constant 168 : index
    %c0_66 = arith.constant 0 : index
    %132 = vector.load %arg3[%c168, %c0_66] : memref<1128x128xf32, #tpu.memory_space<vmem>>, vector<16x8xf32>
    %c184 = arith.constant 184 : index
    %c0_67 = arith.constant 0 : index
    %133 = vector.load %arg3[%c184, %c0_67] : memref<1128x128xf32, #tpu.memory_space<vmem>>, vector<16x8xf32>
    %134 = arith.truncf %130 : vector<8x16xf32> to vector<8x16xbf16>
    %135 = arith.truncf %132 : vector<16x8xf32> to vector<16x8xbf16>
    %cst_68 = arith.constant dense<0.000000e+00> : vector<8x8xf32>
    %136 = tpu.matmul %134, %135, %cst_68 {dimension_numbers = #tpu.dot_dimension_numbers<[1], [0], [0], [1], [0, 0, 1, 1], [], []>} : vector<8x16xbf16>, vector<16x8xbf16>, vector<8x8xf32> -> vector<8x8xf32>
    %137 = arith.truncf %130 : vector<8x16xf32> to vector<8x16xbf16>
    %138 = arith.truncf %131 : vector<16x8xf32> to vector<16x8xbf16>
    %cst_69 = arith.constant dense<0.000000e+00> : vector<8x8xf32>
    %139 = tpu.matmul %137, %138, %cst_69 {dimension_numbers = #tpu.dot_dimension_numbers<[1], [0], [0], [1], [0, 0, 1, 1], [], []>} : vector<8x16xbf16>, vector<16x8xbf16>, vector<8x8xf32> -> vector<8x8xf32>
    %140 = tpu.iota {dimensions = array<i32: 0>} : vector<8x1xi32>
    %c0_i32_70 = arith.constant 0 : i32
    %141 = vector.broadcast %c0_i32_70 : i32 to vector<8x1xi32>
    %142 = arith.cmpi ne, %140, %141 : vector<8x1xi32>
    %c1_i32_71 = arith.constant 1 : i32
    %143 = tpu.dynamic_rotate %139 by %c1_i32_71 dim 0 : vector<8x8xf32>, i32 -> vector<8x8xf32>
    %cst_72 = arith.constant 0.000000e+00 : f32
    %144 = vector.shape_cast %142 : vector<8x1xi1> to vector<8x1xi1>
    %145 = vector.broadcast %144 : vector<8x1xi1> to vector<8x8xi1>
    %146 = vector.broadcast %cst_72 : f32 to vector<8x8xf32>
    %147 = arith.select %145, %143, %146 : vector<8x8xi1>, vector<8x8xf32>
    %148 = arith.addf %136, %147 : vector<8x8xf32>
    %149 = arith.truncf %130 : vector<8x16xf32> to vector<8x16xbf16>
    %150 = arith.truncf %133 : vector<16x8xf32> to vector<16x8xbf16>
    %cst_73 = arith.constant dense<0.000000e+00> : vector<8x8xf32>
    %151 = tpu.matmul %149, %150, %cst_73 {dimension_numbers = #tpu.dot_dimension_numbers<[1], [0], [0], [1], [0, 0, 1, 1], [], []>} : vector<8x16xbf16>, vector<16x8xbf16>, vector<8x8xf32> -> vector<8x8xf32>
    %152 = tpu.iota {dimensions = array<i32: 0>} : vector<8x1xi32>
    %c7_i32 = arith.constant 7 : i32
    %153 = vector.broadcast %c7_i32 : i32 to vector<8x1xi32>
    %154 = arith.cmpi ne, %152, %153 : vector<8x1xi32>
    %c7_i32_74 = arith.constant 7 : i32
    %155 = tpu.dynamic_rotate %151 by %c7_i32_74 dim 0 : vector<8x8xf32>, i32 -> vector<8x8xf32>
    %cst_75 = arith.constant 0.000000e+00 : f32
    %156 = vector.shape_cast %154 : vector<8x1xi1> to vector<8x1xi1>
    %157 = vector.broadcast %156 : vector<8x1xi1> to vector<8x8xi1>
    %158 = vector.broadcast %cst_75 : f32 to vector<8x8xf32>
    %159 = arith.select %157, %155, %158 : vector<8x8xi1>, vector<8x8xf32>
    %160 = arith.addf %148, %159 : vector<8x8xf32>
    %cst_76 = arith.constant 0.000000e+00 : f32
    %161 = vector.broadcast %cst_76 : f32 to vector<8x8xf32>
    %162 = arith.cmpf oge, %160, %161 : vector<8x8xf32>
    %cst_77 = arith.constant 2.000000e-01 : f32
    %163 = vector.broadcast %cst_77 : f32 to vector<8x8xf32>
    %164 = arith.mulf %163, %160 : vector<8x8xf32>
    %165 = arith.select %162, %160, %164 : vector<8x8xi1>, vector<8x8xf32>
    %c200 = arith.constant 200 : index
    %c0_78 = arith.constant 0 : index
    %166 = vector.load %arg3[%c200, %c0_78] : memref<1128x128xf32, #tpu.memory_space<vmem>>, vector<8x8xf32>
    %167 = arith.truncf %165 : vector<8x8xf32> to vector<8x8xbf16>
    %168 = arith.truncf %166 : vector<8x8xf32> to vector<8x8xbf16>
    %cst_79 = arith.constant dense<0.000000e+00> : vector<8x8xf32>
    %169 = tpu.matmul %167, %168, %cst_79 {dimension_numbers = #tpu.dot_dimension_numbers<[1], [0], [0], [1], [0, 0, 1, 1], [], []>} : vector<8x8xbf16>, vector<8x8xbf16>, vector<8x8xf32> -> vector<8x8xf32>
    %cst_80 = arith.constant 0.000000e+00 : f32
    %170 = vector.broadcast %cst_80 : f32 to vector<8x8xf32>
    %171 = arith.cmpf oge, %169, %170 : vector<8x8xf32>
    %cst_81 = arith.constant 2.000000e-01 : f32
    %172 = vector.broadcast %cst_81 : f32 to vector<8x8xf32>
    %173 = arith.mulf %172, %169 : vector<8x8xf32>
    %174 = arith.select %171, %169, %173 : vector<8x8xi1>, vector<8x8xf32>
    %175 = tpu.concatenate %60, %121, %174 in 1 : vector<8x8xf32>, vector<8x8xf32>, vector<8x8xf32> -> vector<8x24xf32>
    %c208 = arith.constant 208 : index
    %c0_82 = arith.constant 0 : index
    %176 = vector.load %arg3[%c208, %c0_82] : memref<1128x128xf32, #tpu.memory_space<vmem>>, vector<24x16xf32>
    %c232 = arith.constant 232 : index
    %c0_83 = arith.constant 0 : index
    %177 = vector.load %arg3[%c232, %c0_83] : memref<1128x128xf32, #tpu.memory_space<vmem>>, vector<24x16xf32>
    %c256 = arith.constant 256 : index
    %c0_84 = arith.constant 0 : index
    %178 = vector.load %arg3[%c256, %c0_84] : memref<1128x128xf32, #tpu.memory_space<vmem>>, vector<24x16xf32>
    %179 = arith.truncf %175 : vector<8x24xf32> to vector<8x24xbf16>
    %180 = arith.truncf %177 : vector<24x16xf32> to vector<24x16xbf16>
    %cst_85 = arith.constant dense<0.000000e+00> : vector<8x16xf32>
    %181 = tpu.matmul %179, %180, %cst_85 {dimension_numbers = #tpu.dot_dimension_numbers<[1], [0], [0], [1], [0, 0, 1, 1], [], []>} : vector<8x24xbf16>, vector<24x16xbf16>, vector<8x16xf32> -> vector<8x16xf32>
    %182 = arith.truncf %175 : vector<8x24xf32> to vector<8x24xbf16>
    %183 = arith.truncf %176 : vector<24x16xf32> to vector<24x16xbf16>
    %cst_86 = arith.constant dense<0.000000e+00> : vector<8x16xf32>
    %184 = tpu.matmul %182, %183, %cst_86 {dimension_numbers = #tpu.dot_dimension_numbers<[1], [0], [0], [1], [0, 0, 1, 1], [], []>} : vector<8x24xbf16>, vector<24x16xbf16>, vector<8x16xf32> -> vector<8x16xf32>
    %185 = tpu.iota {dimensions = array<i32: 0>} : vector<8x1xi32>
    %c0_i32_87 = arith.constant 0 : i32
    %186 = vector.broadcast %c0_i32_87 : i32 to vector<8x1xi32>
    %187 = arith.cmpi ne, %185, %186 : vector<8x1xi32>
    %c1_i32_88 = arith.constant 1 : i32
    %188 = tpu.dynamic_rotate %184 by %c1_i32_88 dim 0 : vector<8x16xf32>, i32 -> vector<8x16xf32>
    %cst_89 = arith.constant 0.000000e+00 : f32
    %189 = vector.shape_cast %187 : vector<8x1xi1> to vector<8x1xi1>
    %190 = vector.broadcast %189 : vector<8x1xi1> to vector<8x16xi1>
    %191 = vector.broadcast %cst_89 : f32 to vector<8x16xf32>
    %192 = arith.select %190, %188, %191 : vector<8x16xi1>, vector<8x16xf32>
    %193 = arith.addf %181, %192 : vector<8x16xf32>
    %194 = arith.truncf %175 : vector<8x24xf32> to vector<8x24xbf16>
    %195 = arith.truncf %178 : vector<24x16xf32> to vector<24x16xbf16>
    %cst_90 = arith.constant dense<0.000000e+00> : vector<8x16xf32>
    %196 = tpu.matmul %194, %195, %cst_90 {dimension_numbers = #tpu.dot_dimension_numbers<[1], [0], [0], [1], [0, 0, 1, 1], [], []>} : vector<8x24xbf16>, vector<24x16xbf16>, vector<8x16xf32> -> vector<8x16xf32>
    %197 = tpu.iota {dimensions = array<i32: 0>} : vector<8x1xi32>
    %c7_i32_91 = arith.constant 7 : i32
    %198 = vector.broadcast %c7_i32_91 : i32 to vector<8x1xi32>
    %199 = arith.cmpi ne, %197, %198 : vector<8x1xi32>
    %c7_i32_92 = arith.constant 7 : i32
    %200 = tpu.dynamic_rotate %196 by %c7_i32_92 dim 0 : vector<8x16xf32>, i32 -> vector<8x16xf32>
    %cst_93 = arith.constant 0.000000e+00 : f32
    %201 = vector.shape_cast %199 : vector<8x1xi1> to vector<8x1xi1>
    %202 = vector.broadcast %201 : vector<8x1xi1> to vector<8x16xi1>
    %203 = vector.broadcast %cst_93 : f32 to vector<8x16xf32>
    %204 = arith.select %202, %200, %203 : vector<8x16xi1>, vector<8x16xf32>
    %205 = arith.addf %193, %204 : vector<8x16xf32>
    %cst_94 = arith.constant 0.000000e+00 : f32
    %206 = vector.broadcast %cst_94 : f32 to vector<8x16xf32>
    %207 = arith.cmpf oge, %205, %206 : vector<8x16xf32>
    %cst_95 = arith.constant 2.000000e-01 : f32
    %208 = vector.broadcast %cst_95 : f32 to vector<8x16xf32>
    %209 = arith.mulf %208, %205 : vector<8x16xf32>
    %210 = arith.select %207, %205, %209 : vector<8x16xi1>, vector<8x16xf32>
    %c280 = arith.constant 280 : index
    %c0_96 = arith.constant 0 : index
    %211 = vector.load %arg3[%c280, %c0_96] : memref<1128x128xf32, #tpu.memory_space<vmem>>, vector<16x16xf32>
    %c296 = arith.constant 296 : index
    %c0_97 = arith.constant 0 : index
    %212 = vector.load %arg3[%c296, %c0_97] : memref<1128x128xf32, #tpu.memory_space<vmem>>, vector<16x16xf32>
    %c312 = arith.constant 312 : index
    %c0_98 = arith.constant 0 : index
    %213 = vector.load %arg3[%c312, %c0_98] : memref<1128x128xf32, #tpu.memory_space<vmem>>, vector<16x16xf32>
    %214 = arith.truncf %210 : vector<8x16xf32> to vector<8x16xbf16>
    %215 = arith.truncf %212 : vector<16x16xf32> to vector<16x16xbf16>
    %cst_99 = arith.constant dense<0.000000e+00> : vector<8x16xf32>
    %216 = tpu.matmul %214, %215, %cst_99 {dimension_numbers = #tpu.dot_dimension_numbers<[1], [0], [0], [1], [0, 0, 1, 1], [], []>} : vector<8x16xbf16>, vector<16x16xbf16>, vector<8x16xf32> -> vector<8x16xf32>
    %217 = arith.truncf %210 : vector<8x16xf32> to vector<8x16xbf16>
    %218 = arith.truncf %211 : vector<16x16xf32> to vector<16x16xbf16>
    %cst_100 = arith.constant dense<0.000000e+00> : vector<8x16xf32>
    %219 = tpu.matmul %217, %218, %cst_100 {dimension_numbers = #tpu.dot_dimension_numbers<[1], [0], [0], [1], [0, 0, 1, 1], [], []>} : vector<8x16xbf16>, vector<16x16xbf16>, vector<8x16xf32> -> vector<8x16xf32>
    %220 = tpu.iota {dimensions = array<i32: 0>} : vector<8x1xi32>
    %c0_i32_101 = arith.constant 0 : i32
    %221 = vector.broadcast %c0_i32_101 : i32 to vector<8x1xi32>
    %222 = arith.cmpi ne, %220, %221 : vector<8x1xi32>
    %c1_i32_102 = arith.constant 1 : i32
    %223 = tpu.dynamic_rotate %219 by %c1_i32_102 dim 0 : vector<8x16xf32>, i32 -> vector<8x16xf32>
    %cst_103 = arith.constant 0.000000e+00 : f32
    %224 = vector.shape_cast %222 : vector<8x1xi1> to vector<8x1xi1>
    %225 = vector.broadcast %224 : vector<8x1xi1> to vector<8x16xi1>
    %226 = vector.broadcast %cst_103 : f32 to vector<8x16xf32>
    %227 = arith.select %225, %223, %226 : vector<8x16xi1>, vector<8x16xf32>
    %228 = arith.addf %216, %227 : vector<8x16xf32>
    %229 = arith.truncf %210 : vector<8x16xf32> to vector<8x16xbf16>
    %230 = arith.truncf %213 : vector<16x16xf32> to vector<16x16xbf16>
    %cst_104 = arith.constant dense<0.000000e+00> : vector<8x16xf32>
    %231 = tpu.matmul %229, %230, %cst_104 {dimension_numbers = #tpu.dot_dimension_numbers<[1], [0], [0], [1], [0, 0, 1, 1], [], []>} : vector<8x16xbf16>, vector<16x16xbf16>, vector<8x16xf32> -> vector<8x16xf32>
    %232 = tpu.iota {dimensions = array<i32: 0>} : vector<8x1xi32>
    %c7_i32_105 = arith.constant 7 : i32
    %233 = vector.broadcast %c7_i32_105 : i32 to vector<8x1xi32>
    %234 = arith.cmpi ne, %232, %233 : vector<8x1xi32>
    %c7_i32_106 = arith.constant 7 : i32
    %235 = tpu.dynamic_rotate %231 by %c7_i32_106 dim 0 : vector<8x16xf32>, i32 -> vector<8x16xf32>
    %cst_107 = arith.constant 0.000000e+00 : f32
    %236 = vector.shape_cast %234 : vector<8x1xi1> to vector<8x1xi1>
    %237 = vector.broadcast %236 : vector<8x1xi1> to vector<8x16xi1>
    %238 = vector.broadcast %cst_107 : f32 to vector<8x16xf32>
    %239 = arith.select %237, %235, %238 : vector<8x16xi1>, vector<8x16xf32>
    %240 = arith.addf %228, %239 : vector<8x16xf32>
    %cst_108 = arith.constant 0.000000e+00 : f32
    %241 = vector.broadcast %cst_108 : f32 to vector<8x16xf32>
    %242 = arith.cmpf oge, %240, %241 : vector<8x16xf32>
    %cst_109 = arith.constant 2.000000e-01 : f32
    %243 = vector.broadcast %cst_109 : f32 to vector<8x16xf32>
    %244 = arith.mulf %243, %240 : vector<8x16xf32>
    %245 = arith.select %242, %240, %244 : vector<8x16xi1>, vector<8x16xf32>
    %c0_110 = arith.constant 0 : index
    %c0_111 = arith.constant 0 : index
    %246 = vector.load %arg5[%c0_110, %c0_111] : memref<16x64xf32, #tpu.memory_space<vmem>>, vector<8x16xf32>
    tpu.vector_store %arg5[%c0_110, %c0_111], %245 {strides = array<i32>} : memref<16x64xf32, #tpu.memory_space<vmem>>, vector<8x16xf32>,
    %c0_112 = arith.constant 0 : index
    %c0_113 = arith.constant 0 : index
    %247 = tpu.strided_load %arg5[%c0_112, %c0_113] {strides = array<i32: 2, 1>} : memref<16x64xf32, #tpu.memory_space<vmem>>, vector<4x16xf32>
    %c1_114 = arith.constant 1 : index
    %c0_115 = arith.constant 0 : index
    %248 = tpu.strided_load %arg5[%c1_114, %c0_115] {strides = array<i32: 2, 1>} : memref<16x64xf32, #tpu.memory_space<vmem>>, vector<4x16xf32>
    %249 = arith.maximumf %247, %248 : vector<4x16xf32>
    %c328 = arith.constant 328 : index
    %c0_116 = arith.constant 0 : index
    %250 = vector.load %arg3[%c328, %c0_116] : memref<1128x128xf32, #tpu.memory_space<vmem>>, vector<16x32xf32>
    %c344 = arith.constant 344 : index
    %c0_117 = arith.constant 0 : index
    %251 = vector.load %arg3[%c344, %c0_117] : memref<1128x128xf32, #tpu.memory_space<vmem>>, vector<16x32xf32>
    %c360 = arith.constant 360 : index
    %c0_118 = arith.constant 0 : index
    %252 = vector.load %arg3[%c360, %c0_118] : memref<1128x128xf32, #tpu.memory_space<vmem>>, vector<16x32xf32>
    %253 = arith.truncf %249 : vector<4x16xf32> to vector<4x16xbf16>
    %254 = arith.truncf %251 : vector<16x32xf32> to vector<16x32xbf16>
    %cst_119 = arith.constant dense<0.000000e+00> : vector<4x32xf32>
    %255 = tpu.matmul %253, %254, %cst_119 {dimension_numbers = #tpu.dot_dimension_numbers<[1], [0], [0], [1], [0, 0, 1, 1], [], []>} : vector<4x16xbf16>, vector<16x32xbf16>, vector<4x32xf32> -> vector<4x32xf32>
    %256 = arith.truncf %249 : vector<4x16xf32> to vector<4x16xbf16>
    %257 = arith.truncf %250 : vector<16x32xf32> to vector<16x32xbf16>
    %cst_120 = arith.constant dense<0.000000e+00> : vector<4x32xf32>
    %258 = tpu.matmul %256, %257, %cst_120 {dimension_numbers = #tpu.dot_dimension_numbers<[1], [0], [0], [1], [0, 0, 1, 1], [], []>} : vector<4x16xbf16>, vector<16x32xbf16>, vector<4x32xf32> -> vector<4x32xf32>
    %259 = tpu.iota {dimensions = array<i32: 0>} : vector<4x4xi32>
    %260 = tpu.iota {dimensions = array<i32: 1>} : vector<4x4xi32>
    %c1_i32_121 = arith.constant 1 : i32
    %261 = vector.broadcast %c1_i32_121 : i32 to vector<4x4xi32>
    %262 = arith.subi %259, %261 : vector<4x4xi32>
    %263 = arith.cmpi eq, %260, %262 : vector<4x4xi32>
    %264 = arith.extui %263 : vector<4x4xi1> to vector<4x4xi32>
    %265 = arith.sitofp %264 : vector<4x4xi32> to vector<4x4xf32>
    %cst_122 = arith.constant dense<0.000000e+00> : vector<4x32xf32>
    %266 = tpu.matmul %265, %258, %cst_122 {dimension_numbers = #tpu.dot_dimension_numbers<[1], [0], [0], [1], [0, 0, 1, 1], [], []>} : vector<4x4xf32>, vector<4x32xf32>, vector<4x32xf32> -> vector<4x32xf32>
    %267 = arith.addf %255, %266 : vector<4x32xf32>
    %268 = arith.truncf %249 : vector<4x16xf32> to vector<4x16xbf16>
    %269 = arith.truncf %252 : vector<16x32xf32> to vector<16x32xbf16>
    %cst_123 = arith.constant dense<0.000000e+00> : vector<4x32xf32>
    %270 = tpu.matmul %268, %269, %cst_123 {dimension_numbers = #tpu.dot_dimension_numbers<[1], [0], [0], [1], [0, 0, 1, 1], [], []>} : vector<4x16xbf16>, vector<16x32xbf16>, vector<4x32xf32> -> vector<4x32xf32>
    %271 = tpu.iota {dimensions = array<i32: 0>} : vector<4x4xi32>
    %272 = tpu.iota {dimensions = array<i32: 1>} : vector<4x4xi32>
    %c1_i32_124 = arith.constant 1 : i32
    %273 = vector.broadcast %c1_i32_124 : i32 to vector<4x4xi32>
    %274 = arith.addi %271, %273 : vector<4x4xi32>
    %275 = arith.cmpi eq, %272, %274 : vector<4x4xi32>
    %276 = arith.extui %275 : vector<4x4xi1> to vector<4x4xi32>
    %277 = arith.sitofp %276 : vector<4x4xi32> to vector<4x4xf32>
    %cst_125 = arith.constant dense<0.000000e+00> : vector<4x32xf32>
    %278 = tpu.matmul %277, %270, %cst_125 {dimension_numbers = #tpu.dot_dimension_numbers<[1], [0], [0], [1], [0, 0, 1, 1], [], []>} : vector<4x4xf32>, vector<4x32xf32>, vector<4x32xf32> -> vector<4x32xf32>
    %279 = arith.addf %267, %278 : vector<4x32xf32>
    %cst_126 = arith.constant 0.000000e+00 : f32
    %280 = vector.broadcast %cst_126 : f32 to vector<4x32xf32>
    %281 = arith.cmpf oge, %279, %280 : vector<4x32xf32>
    %cst_127 = arith.constant 2.000000e-01 : f32
    %282 = vector.broadcast %cst_127 : f32 to vector<4x32xf32>
    %283 = arith.mulf %282, %279 : vector<4x32xf32>
    %284 = arith.select %281, %279, %283 : vector<4x32xi1>, vector<4x32xf32>
    %c376 = arith.constant 376 : index
    %c0_128 = arith.constant 0 : index
    %285 = vector.load %arg3[%c376, %c0_128] : memref<1128x128xf32, #tpu.memory_space<vmem>>, vector<32x32xf32>
    %c408 = arith.constant 408 : index
    %c0_129 = arith.constant 0 : index
    %286 = vector.load %arg3[%c408, %c0_129] : memref<1128x128xf32, #tpu.memory_space<vmem>>, vector<32x32xf32>
    %c440 = arith.constant 440 : index
    %c0_130 = arith.constant 0 : index
    %287 = vector.load %arg3[%c440, %c0_130] : memref<1128x128xf32, #tpu.memory_space<vmem>>, vector<32x32xf32>
    %288 = arith.truncf %284 : vector<4x32xf32> to vector<4x32xbf16>
    %289 = arith.truncf %286 : vector<32x32xf32> to vector<32x32xbf16>
    %cst_131 = arith.constant dense<0.000000e+00> : vector<4x32xf32>
    %290 = tpu.matmul %288, %289, %cst_131 {dimension_numbers = #tpu.dot_dimension_numbers<[1], [0], [0], [1], [0, 0, 1, 1], [], []>} : vector<4x32xbf16>, vector<32x32xbf16>, vector<4x32xf32> -> vector<4x32xf32>
    %291 = arith.truncf %284 : vector<4x32xf32> to vector<4x32xbf16>
    %292 = arith.truncf %285 : vector<32x32xf32> to vector<32x32xbf16>
    %cst_132 = arith.constant dense<0.000000e+00> : vector<4x32xf32>
    %293 = tpu.matmul %291, %292, %cst_132 {dimension_numbers = #tpu.dot_dimension_numbers<[1], [0], [0], [1], [0, 0, 1, 1], [], []>} : vector<4x32xbf16>, vector<32x32xbf16>, vector<4x32xf32> -> vector<4x32xf32>
    %294 = tpu.iota {dimensions = array<i32: 0>} : vector<4x4xi32>
    %295 = tpu.iota {dimensions = array<i32: 1>} : vector<4x4xi32>
    %c1_i32_133 = arith.constant 1 : i32
    %296 = vector.broadcast %c1_i32_133 : i32 to vector<4x4xi32>
    %297 = arith.subi %294, %296 : vector<4x4xi32>
    %298 = arith.cmpi eq, %295, %297 : vector<4x4xi32>
    %299 = arith.extui %298 : vector<4x4xi1> to vector<4x4xi32>
    %300 = arith.sitofp %299 : vector<4x4xi32> to vector<4x4xf32>
    %cst_134 = arith.constant dense<0.000000e+00> : vector<4x32xf32>
    %301 = tpu.matmul %300, %293, %cst_134 {dimension_numbers = #tpu.dot_dimension_numbers<[1], [0], [0], [1], [0, 0, 1, 1], [], []>} : vector<4x4xf32>, vector<4x32xf32>, vector<4x32xf32> -> vector<4x32xf32>
    %302 = arith.addf %290, %301 : vector<4x32xf32>
    %303 = arith.truncf %284 : vector<4x32xf32> to vector<4x32xbf16>
    %304 = arith.truncf %287 : vector<32x32xf32> to vector<32x32xbf16>
    %cst_135 = arith.constant dense<0.000000e+00> : vector<4x32xf32>
    %305 = tpu.matmul %303, %304, %cst_135 {dimension_numbers = #tpu.dot_dimension_numbers<[1], [0], [0], [1], [0, 0, 1, 1], [], []>} : vector<4x32xbf16>, vector<32x32xbf16>, vector<4x32xf32> -> vector<4x32xf32>
    %306 = tpu.iota {dimensions = array<i32: 0>} : vector<4x4xi32>
    %307 = tpu.iota {dimensions = array<i32: 1>} : vector<4x4xi32>
    %c1_i32_136 = arith.constant 1 : i32
    %308 = vector.broadcast %c1_i32_136 : i32 to vector<4x4xi32>
    %309 = arith.addi %306, %308 : vector<4x4xi32>
    %310 = arith.cmpi eq, %307, %309 : vector<4x4xi32>
    %311 = arith.extui %310 : vector<4x4xi1> to vector<4x4xi32>
    %312 = arith.sitofp %311 : vector<4x4xi32> to vector<4x4xf32>
    %cst_137 = arith.constant dense<0.000000e+00> : vector<4x32xf32>
    %313 = tpu.matmul %312, %305, %cst_137 {dimension_numbers = #tpu.dot_dimension_numbers<[1], [0], [0], [1], [0, 0, 1, 1], [], []>} : vector<4x4xf32>, vector<4x32xf32>, vector<4x32xf32> -> vector<4x32xf32>
    %314 = arith.addf %302, %313 : vector<4x32xf32>
    %cst_138 = arith.constant 0.000000e+00 : f32
    %315 = vector.broadcast %cst_138 : f32 to vector<4x32xf32>
    %316 = arith.cmpf oge, %314, %315 : vector<4x32xf32>
    %cst_139 = arith.constant 2.000000e-01 : f32
    %317 = vector.broadcast %cst_139 : f32 to vector<4x32xf32>
    %318 = arith.mulf %317, %314 : vector<4x32xf32>
    %319 = arith.select %316, %314, %318 : vector<4x32xi1>, vector<4x32xf32>
    %c0_140 = arith.constant 0 : index
    %c0_141 = arith.constant 0 : index
    %320 = vector.load %arg5[%c0_140, %c0_141] : memref<16x64xf32, #tpu.memory_space<vmem>>, vector<4x32xf32>
    tpu.vector_store %arg5[%c0_140, %c0_141], %319 {strides = array<i32>} : memref<16x64xf32, #tpu.memory_space<vmem>>, vector<4x32xf32>,
    %c0_142 = arith.constant 0 : index
    %c0_143 = arith.constant 0 : index
    %321 = tpu.strided_load %arg5[%c0_142, %c0_143] {strides = array<i32: 2, 1>} : memref<16x64xf32, #tpu.memory_space<vmem>>, vector<2x32xf32>
    %c1_144 = arith.constant 1 : index
    %c0_145 = arith.constant 0 : index
    %322 = tpu.strided_load %arg5[%c1_144, %c0_145] {strides = array<i32: 2, 1>} : memref<16x64xf32, #tpu.memory_space<vmem>>, vector<2x32xf32>
    %323 = arith.maximumf %321, %322 : vector<2x32xf32>
    %c472 = arith.constant 472 : index
    %c0_146 = arith.constant 0 : index
    %324 = vector.load %arg3[%c472, %c0_146] : memref<1128x128xf32, #tpu.memory_space<vmem>>, vector<32x64xf32>
    %c504 = arith.constant 504 : index
    %c0_147 = arith.constant 0 : index
    %325 = vector.load %arg3[%c504, %c0_147] : memref<1128x128xf32, #tpu.memory_space<vmem>>, vector<32x64xf32>
    %c536 = arith.constant 536 : index
    %c0_148 = arith.constant 0 : index
    %326 = vector.load %arg3[%c536, %c0_148] : memref<1128x128xf32, #tpu.memory_space<vmem>>, vector<32x64xf32>
    %327 = arith.truncf %323 : vector<2x32xf32> to vector<2x32xbf16>
    %328 = arith.truncf %325 : vector<32x64xf32> to vector<32x64xbf16>
    %cst_149 = arith.constant dense<0.000000e+00> : vector<2x64xf32>
    %329 = tpu.matmul %327, %328, %cst_149 {dimension_numbers = #tpu.dot_dimension_numbers<[1], [0], [0], [1], [0, 0, 1, 1], [], []>} : vector<2x32xbf16>, vector<32x64xbf16>, vector<2x64xf32> -> vector<2x64xf32>
    %330 = arith.truncf %323 : vector<2x32xf32> to vector<2x32xbf16>
    %331 = arith.truncf %324 : vector<32x64xf32> to vector<32x64xbf16>
    %cst_150 = arith.constant dense<0.000000e+00> : vector<2x64xf32>
    %332 = tpu.matmul %330, %331, %cst_150 {dimension_numbers = #tpu.dot_dimension_numbers<[1], [0], [0], [1], [0, 0, 1, 1], [], []>} : vector<2x32xbf16>, vector<32x64xbf16>, vector<2x64xf32> -> vector<2x64xf32>
    %333 = tpu.iota {dimensions = array<i32: 0>} : vector<2x2xi32>
    %334 = tpu.iota {dimensions = array<i32: 1>} : vector<2x2xi32>
    %c1_i32_151 = arith.constant 1 : i32
    %335 = vector.broadcast %c1_i32_151 : i32 to vector<2x2xi32>
    %336 = arith.subi %333, %335 : vector<2x2xi32>
    %337 = arith.cmpi eq, %334, %336 : vector<2x2xi32>
    %338 = arith.extui %337 : vector<2x2xi1> to vector<2x2xi32>
    %339 = arith.sitofp %338 : vector<2x2xi32> to vector<2x2xf32>
    %cst_152 = arith.constant dense<0.000000e+00> : vector<2x64xf32>
    %340 = tpu.matmul %339, %332, %cst_152 {dimension_numbers = #tpu.dot_dimension_numbers<[1], [0], [0], [1], [0, 0, 1, 1], [], []>} : vector<2x2xf32>, vector<2x64xf32>, vector<2x64xf32> -> vector<2x64xf32>
    %341 = arith.addf %329, %340 : vector<2x64xf32>
    %342 = arith.truncf %323 : vector<2x32xf32> to vector<2x32xbf16>
    %343 = arith.truncf %326 : vector<32x64xf32> to vector<32x64xbf16>
    %cst_153 = arith.constant dense<0.000000e+00> : vector<2x64xf32>
    %344 = tpu.matmul %342, %343, %cst_153 {dimension_numbers = #tpu.dot_dimension_numbers<[1], [0], [0], [1], [0, 0, 1, 1], [], []>} : vector<2x32xbf16>, vector<32x64xbf16>, vector<2x64xf32> -> vector<2x64xf32>
    %345 = tpu.iota {dimensions = array<i32: 0>} : vector<2x2xi32>
    %346 = tpu.iota {dimensions = array<i32: 1>} : vector<2x2xi32>
    %c1_i32_154 = arith.constant 1 : i32
    %347 = vector.broadcast %c1_i32_154 : i32 to vector<2x2xi32>
    %348 = arith.addi %345, %347 : vector<2x2xi32>
    %349 = arith.cmpi eq, %346, %348 : vector<2x2xi32>
    %350 = arith.extui %349 : vector<2x2xi1> to vector<2x2xi32>
    %351 = arith.sitofp %350 : vector<2x2xi32> to vector<2x2xf32>
    %cst_155 = arith.constant dense<0.000000e+00> : vector<2x64xf32>
    %352 = tpu.matmul %351, %344, %cst_155 {dimension_numbers = #tpu.dot_dimension_numbers<[1], [0], [0], [1], [0, 0, 1, 1], [], []>} : vector<2x2xf32>, vector<2x64xf32>, vector<2x64xf32> -> vector<2x64xf32>
    %353 = arith.addf %341, %352 : vector<2x64xf32>
    %cst_156 = arith.constant 0.000000e+00 : f32
    %354 = vector.broadcast %cst_156 : f32 to vector<2x64xf32>
    %355 = arith.cmpf oge, %353, %354 : vector<2x64xf32>
    %cst_157 = arith.constant 2.000000e-01 : f32
    %356 = vector.broadcast %cst_157 : f32 to vector<2x64xf32>
    %357 = arith.mulf %356, %353 : vector<2x64xf32>
    %358 = arith.select %355, %353, %357 : vector<2x64xi1>, vector<2x64xf32>
    %c568 = arith.constant 568 : index
    %c0_158 = arith.constant 0 : index
    %359 = vector.load %arg3[%c568, %c0_158] : memref<1128x128xf32, #tpu.memory_space<vmem>>, vector<64x64xf32>
    %c632 = arith.constant 632 : index
    %c0_159 = arith.constant 0 : index
    %360 = vector.load %arg3[%c632, %c0_159] : memref<1128x128xf32, #tpu.memory_space<vmem>>, vector<64x64xf32>
    %c696 = arith.constant 696 : index
    %c0_160 = arith.constant 0 : index
    %361 = vector.load %arg3[%c696, %c0_160] : memref<1128x128xf32, #tpu.memory_space<vmem>>, vector<64x64xf32>
    %362 = arith.truncf %358 : vector<2x64xf32> to vector<2x64xbf16>
    %363 = arith.truncf %360 : vector<64x64xf32> to vector<64x64xbf16>
    %cst_161 = arith.constant dense<0.000000e+00> : vector<2x64xf32>
    %364 = tpu.matmul %362, %363, %cst_161 {dimension_numbers = #tpu.dot_dimension_numbers<[1], [0], [0], [1], [0, 0, 1, 1], [], []>} : vector<2x64xbf16>, vector<64x64xbf16>, vector<2x64xf32> -> vector<2x64xf32>
    %365 = arith.truncf %358 : vector<2x64xf32> to vector<2x64xbf16>
    %366 = arith.truncf %359 : vector<64x64xf32> to vector<64x64xbf16>
    %cst_162 = arith.constant dense<0.000000e+00> : vector<2x64xf32>
    %367 = tpu.matmul %365, %366, %cst_162 {dimension_numbers = #tpu.dot_dimension_numbers<[1], [0], [0], [1], [0, 0, 1, 1], [], []>} : vector<2x64xbf16>, vector<64x64xbf16>, vector<2x64xf32> -> vector<2x64xf32>
    %368 = tpu.iota {dimensions = array<i32: 0>} : vector<2x2xi32>
    %369 = tpu.iota {dimensions = array<i32: 1>} : vector<2x2xi32>
    %c1_i32_163 = arith.constant 1 : i32
    %370 = vector.broadcast %c1_i32_163 : i32 to vector<2x2xi32>
    %371 = arith.subi %368, %370 : vector<2x2xi32>
    %372 = arith.cmpi eq, %369, %371 : vector<2x2xi32>
    %373 = arith.extui %372 : vector<2x2xi1> to vector<2x2xi32>
    %374 = arith.sitofp %373 : vector<2x2xi32> to vector<2x2xf32>
    %cst_164 = arith.constant dense<0.000000e+00> : vector<2x64xf32>
    %375 = tpu.matmul %374, %367, %cst_164 {dimension_numbers = #tpu.dot_dimension_numbers<[1], [0], [0], [1], [0, 0, 1, 1], [], []>} : vector<2x2xf32>, vector<2x64xf32>, vector<2x64xf32> -> vector<2x64xf32>
    %376 = arith.addf %364, %375 : vector<2x64xf32>
    %377 = arith.truncf %358 : vector<2x64xf32> to vector<2x64xbf16>
    %378 = arith.truncf %361 : vector<64x64xf32> to vector<64x64xbf16>
    %cst_165 = arith.constant dense<0.000000e+00> : vector<2x64xf32>
    %379 = tpu.matmul %377, %378, %cst_165 {dimension_numbers = #tpu.dot_dimension_numbers<[1], [0], [0], [1], [0, 0, 1, 1], [], []>} : vector<2x64xbf16>, vector<64x64xbf16>, vector<2x64xf32> -> vector<2x64xf32>
    %380 = tpu.iota {dimensions = array<i32: 0>} : vector<2x2xi32>
    %381 = tpu.iota {dimensions = array<i32: 1>} : vector<2x2xi32>
    %c1_i32_166 = arith.constant 1 : i32
    %382 = vector.broadcast %c1_i32_166 : i32 to vector<2x2xi32>
    %383 = arith.addi %380, %382 : vector<2x2xi32>
    %384 = arith.cmpi eq, %381, %383 : vector<2x2xi32>
    %385 = arith.extui %384 : vector<2x2xi1> to vector<2x2xi32>
    %386 = arith.sitofp %385 : vector<2x2xi32> to vector<2x2xf32>
    %cst_167 = arith.constant dense<0.000000e+00> : vector<2x64xf32>
    %387 = tpu.matmul %386, %379, %cst_167 {dimension_numbers = #tpu.dot_dimension_numbers<[1], [0], [0], [1], [0, 0, 1, 1], [], []>} : vector<2x2xf32>, vector<2x64xf32>, vector<2x64xf32> -> vector<2x64xf32>
    %388 = arith.addf %376, %387 : vector<2x64xf32>
    %cst_168 = arith.constant 0.000000e+00 : f32
    %389 = vector.broadcast %cst_168 : f32 to vector<2x64xf32>
    %390 = arith.cmpf oge, %388, %389 : vector<2x64xf32>
    %cst_169 = arith.constant 2.000000e-01 : f32
    %391 = vector.broadcast %cst_169 : f32 to vector<2x64xf32>
    %392 = arith.mulf %391, %388 : vector<2x64xf32>
    %393 = arith.select %390, %388, %392 : vector<2x64xi1>, vector<2x64xf32>
    %cst_170 = arith.constant dense<0xFF800000> : vector<64xf32>
    %394 = vector.multi_reduction <maximumf>, %393, %cst_170 [0] : vector<2x64xf32> to vector<64xf32>
    %395 = vector.shape_cast %394 : vector<64xf32> to vector<1x64xf32>
    %c760 = arith.constant 760 : index
    %c0_171 = arith.constant 0 : index
    %396 = vector.load %arg3[%c760, %c0_171] : memref<1128x128xf32, #tpu.memory_space<vmem>>, vector<64x128xf32>
    %397 = arith.truncf %395 : vector<1x64xf32> to vector<1x64xbf16>
    %398 = arith.truncf %396 : vector<64x128xf32> to vector<64x128xbf16>
    %cst_172 = arith.constant dense<0.000000e+00> : vector<1x128xf32>
    %399 = tpu.matmul %397, %398, %cst_172 {dimension_numbers = #tpu.dot_dimension_numbers<[1], [0], [0], [1], [0, 0, 1, 1], [], []>} : vector<1x64xbf16>, vector<64x128xbf16>, vector<1x128xf32> -> vector<1x128xf32>
    %c824 = arith.constant 824 : index
    %c0_173 = arith.constant 0 : index
    %400 = vector.load %arg3[%c824, %c0_173] : memref<1128x128xf32, #tpu.memory_space<vmem>>, vector<1x128xf32>
    %401 = arith.addf %399, %400 : vector<1x128xf32>
    %cst_174 = arith.constant 0.000000e+00 : f32
    %402 = vector.broadcast %cst_174 : f32 to vector<1x128xf32>
    %403 = arith.cmpf oge, %401, %402 : vector<1x128xf32>
    %cst_175 = arith.constant 2.000000e-01 : f32
    %404 = vector.broadcast %cst_175 : f32 to vector<1x128xf32>
    %405 = arith.mulf %404, %401 : vector<1x128xf32>
    %406 = arith.select %403, %401, %405 : vector<1x128xi1>, vector<1x128xf32>
    %c832 = arith.constant 832 : index
    %c0_176 = arith.constant 0 : index
    %407 = vector.load %arg3[%c832, %c0_176] : memref<1128x128xf32, #tpu.memory_space<vmem>>, vector<128x128xf32>
    %408 = arith.truncf %406 : vector<1x128xf32> to vector<1x128xbf16>
    %409 = arith.truncf %407 : vector<128x128xf32> to vector<128x128xbf16>
    %cst_177 = arith.constant dense<0.000000e+00> : vector<1x128xf32>
    %410 = tpu.matmul %408, %409, %cst_177 {dimension_numbers = #tpu.dot_dimension_numbers<[1], [0], [0], [1], [0, 0, 1, 1], [], []>} : vector<1x128xbf16>, vector<128x128xbf16>, vector<1x128xf32> -> vector<1x128xf32>
    %c960 = arith.constant 960 : index
    %c0_178 = arith.constant 0 : index
    %411 = vector.load %arg3[%c960, %c0_178] : memref<1128x128xf32, #tpu.memory_space<vmem>>, vector<1x128xf32>
    %412 = arith.addf %410, %411 : vector<1x128xf32>
    %cst_179 = arith.constant 0.000000e+00 : f32
    %413 = vector.broadcast %cst_179 : f32 to vector<1x128xf32>
    %414 = arith.cmpf oge, %412, %413 : vector<1x128xf32>
    %cst_180 = arith.constant 2.000000e-01 : f32
    %415 = vector.broadcast %cst_180 : f32 to vector<1x128xf32>
    %416 = arith.mulf %415, %412 : vector<1x128xf32>
    %417 = arith.select %414, %412, %416 : vector<1x128xi1>, vector<1x128xf32>
    %c968 = arith.constant 968 : index
    %c0_181 = arith.constant 0 : index
    %418 = vector.load %arg3[%c968, %c0_181] : memref<1128x128xf32, #tpu.memory_space<vmem>>, vector<128x5xf32>
    %419 = arith.truncf %417 : vector<1x128xf32> to vector<1x128xbf16>
    %420 = arith.truncf %418 : vector<128x5xf32> to vector<128x5xbf16>
    %cst_182 = arith.constant dense<0.000000e+00> : vector<1x5xf32>
    %421 = tpu.matmul %419, %420, %cst_182 {dimension_numbers = #tpu.dot_dimension_numbers<[1], [0], [0], [1], [0, 0, 1, 1], [], []>} : vector<1x128xbf16>, vector<128x5xbf16>, vector<1x5xf32> -> vector<1x5xf32>
    %c1096 = arith.constant 1096 : index
    %c0_183 = arith.constant 0 : index
    %422 = vector.load %arg3[%c1096, %c0_183] : memref<1128x128xf32, #tpu.memory_space<vmem>>, vector<1x5xf32>
    %423 = arith.addf %421, %422 : vector<1x5xf32>
    %c0_184 = arith.constant 0 : index
    %c0_185 = arith.constant 0 : index
    %c0_186 = arith.constant 0 : index
    %424 = vector.load %arg4[%c0_184, %c0_185, %c0_186] : memref<1x1x5xf32, #tpu.memory_space<vmem>>, vector<1x1x5xf32>
    %425 = vector.shape_cast %424 : vector<1x1x5xf32> to vector<1x5xf32>
    %426 = vector.shape_cast %423 : vector<1x5xf32> to vector<1x1x5xf32>
    tpu.vector_store %arg4[%c0_184, %c0_185, %c0_186], %426 {strides = array<i32>} : memref<1x1x5xf32, #tpu.memory_space<vmem>>, vector<1x1x5xf32>,
    return
  }
  func.func @transform_0(%arg0: i32) -> (i32, i32, i32) {
    %c0_i32 = arith.constant 0 : i32
    %c0_i32_0 = arith.constant 0 : i32
    %c0_i32_1 = arith.constant 0 : i32
    return %arg0, %c0_i32, %c0_i32_0 : i32, i32, i32
  }
  func.func @transform_1(%arg0: i32) -> (i32, i32, i32) {
    %c0_i32 = arith.constant 0 : i32
    %c0_i32_0 = arith.constant 0 : i32
    %c0_i32_1 = arith.constant 0 : i32
    return %arg0, %c0_i32, %c0_i32_0 : i32, i32, i32
  }
  func.func @transform_2(%arg0: i32) -> (i32, i32) {
    %c0_i32 = arith.constant 0 : i32
    %c0_i32_0 = arith.constant 0 : i32
    %c0_i32_1 = arith.constant 0 : i32
    return %c0_i32, %c0_i32_0 : i32, i32
  }
  func.func @transform_3(%arg0: i32) -> (i32, i32, i32) {
    %c0_i32 = arith.constant 0 : i32
    %c0_i32_0 = arith.constant 0 : i32
    %c0_i32_1 = arith.constant 0 : i32
    return %arg0, %c0_i32, %c0_i32_0 : i32, i32, i32
  }
}

</mosaic_0001>

<bundles_post_ra>
// kernel: tpu_custom_call.1
= control target key start
LH: loop header
LB: loop body
LE: loop exit
PB: predicated region body
PF: predicated region fallthrough
CT: control target
= control target key end

     0   :  { %8 = vsyncpa [#allocation4], 0  ;;  %s4176_s0 = inlined_call_operand.vmem [shape: f32[2,16,6], index: 0, kind: input, shape index: {}]   ;;  %s4177_s1 = inlined_call_operand.vmem [shape: f32[2,16,12], index: 1, kind: input, shape index: {}]   ;;  %s4178_s2 = inlined_call_operand.hbm [shape: f32[1128,128], index: 2, kind: input, shape index: {}]   ;;  %s4179_s3 = inlined_call_operand.hbm [shape: f32[2,1,5], index: 3, kind: output, shape index: {}]  }
   0x1   :  { %9 = vsyncpa [#allocation5], 0 }
   0x2   :  { %11 = vsyncpa [#allocation5 + $0x1], 0  ;;  %s3732_s12 = smov 0   ;;  %s3734_s13 = smov 0  }
   0x3   :  { %s3736_s14 = smov 0   ;;  %s3738_s15 = smov 0  }
   0x4 LB: > { %s3753_s16 = sadd.s32 4294967295, %s3701_s15   ;;  %s3002_s17 = sadd.s32 4294967294, %s3701_s15   ;;  %s3701_s15 = sphi %s3738_s15, %s4195_s15   ;;  %s3697_s14 = sphi %s3736_s14, %s4194_s14   ;;  %s3693_s13 = sphi %s3734_s13, %s4193_s13   ;;  %s3689_s12 = sphi %s3732_s12, %s4192_s12  }
   0x5   : > { %s3757_s18 = sadd.s32 1, %s3701_s15   ;;  %s97_s19 = sadd.s32 1, %s3697_s14 }
   0x6   : > { %s94_s20 = ssub.s32 %s3701_s15, %s3757_s18  ;;  %p107_p0 = scmp.ne.s32.totalorder %s3697_s14, %s3693_s13 }
   0x7   : > { %p95_p1 = scmp.eq.s32.totalorder %s94_s20, 0  ;;  %p108_p2 = scmp.eq.s32.totalorder %s3753_s16, 1 }
   0x8   : > { %p113_p3 = scmp.ne.s32.totalorder %s3693_s13, %s3689_s12  ;;  %p114_p4 = scmp.eq.s32.totalorder %s3002_s17, 1 }
   0x9   : > { %s3768_s21 = scalar_select %p95_p1, %s3697_s14, %s97_s19  }
   0xa   : > { %p3770_p5 = por %p108_p2, %p107_p0  ;;  %p3774_p6 = por %p114_p4, %p113_p3 }
   0xb   : > { %p3003_p7 = scmp.ge.s32.totalorder %s3701_s15, 1  ;;  %p121_p8 = scmp.lt.s32.totalorder %s3701_s15, 3 }
   0xc   : > { %s4183_s22 = scalar_select %p3770_p5, 1, 0 }
   0xd   : > { %s4184_s23 = scalar_select %p3774_p6, 1, 0 }
   0xe   : > { %p4180_p9 = scmp.eq.s32.totalorder %s3753_s16, 0  ;;  %p3781_p10 = pnand %p3003_p7, %p121_p8 }
   0xf   : > { %s3703_s25 = smov [#allocation3]   ;;  %s3607_s30 = scalar_lea.hbm %s4178_s2, 18048 }
  0x10   : > { %s4185_s24 = scalar_select %p3781_p10, 1, 0 }
  0x11   : > { %s133_s26 = sshll.u32 %s3703_s25, 4  ;;  %p3556_p11 = pneg %p3781_p10  ;;  %s134_s26 = int_to_ptr.vmem [resolvable:$true] %s133_s26 }
  0x12   : > { %p3608_p13 = scmp.ne.s32.totalorder %s4178_s2, %s3607_s30  ;;  %p3614_p3 = scmp.lt.u32.totalorder %s3607_s30, %s4178_s2 }
  0x13   : > { %p3789_p12 = pnand %p4180_p9, %p3556_p11 }
  0x15   : > { %p3609_p0 = pneg %p3789_p12 }
  0x17   : > { %p3610_p1 = pnand %p3609_p0, %p3608_p13 }
  0x19   : > { %p3611_p2 = pneg %p3610_p1 }
  0x1b   : > { %p3616_p4 = pnand %p3614_p3, %p3611_p2 }
  0x1d   : > { %3619 = shalt.err (!%p3616_p4)
}
  0x1e   : > { %s3620_s8 = scalar_lea.vmem %s134_s26, 18048  ;;  %p3628_p9 = scmp.lt.s32.totalorder %s134_s26, %s134_s26 }
  0x1f   : > { %p3621_p7 = scmp.ne.s32.totalorder %s134_s26, %s3620_s8  ;;  %p3629_p6 = scmp.lt.s32.totalorder %s3620_s8, %s3620_s8 }
  0x21   : > { %p3623_p8 = pnand %p3621_p7, %p3609_p0  ;;  %p3630_p5 = por %p3629_p6, %p3628_p9 }
  0x23   : > { %p3624_p11 = pneg %p3623_p8 }
  0x25   : > { %p3631_p10 = pnand %p3630_p5, %p3624_p11 }
  0x27   : > { %3634 = shalt.err (!%p3631_p10)
}
  0x28   : > { %s3704_s9 = smov 128   ;;  %s3705_s10 = smov 8  }
  0x29   : > { %3559 = dma.hbm_to_vmem [thread:$0]  (!%p3789_p12), %s4178_s2, 18048, %s134_s26, [#allocation4], %s3704_s9, %s3704_s9, %s3705_s10  }
  0x2a   : > { %p4187_p13 = scmp.ne.s32.totalorder %s4185_s24, 0 }
  0x2b   : > { %p4188_p1 = scmp.eq.s32.totalorder (!%p4187_p13), %s3753_s16, 0 }
  0x2c   : > { %165 = sbr.rel (%p4187_p13) target bundleno = 4909 (0x132d), region = 32 }
  0x33   : > { %3680 = dma.done.wait (%p4188_p1), [#allocation4], 18048   ;;  %p4189_p0 = pmov %p4188_p1 }
  0x34   : > { %p193_p5 = scmp.lt.s32.totalorder %s3753_s16, 1  ;;  %v3706_v0 = vmov 0.0   ;;  %vm3707_vm0 = vmmov 0   ;;  %v208_v1 = vld [vmem:[#allocation3] sm:$0x3f]  ;;  %vm215_vm1 = vcmask 1042432   ;;  %v320_v35 = vlaneseq }
  0x35   : > { %3682 = vsyncadd (%p4189_p0), [#allocation4], 4294949248  ;;  %3203 = vmatprep.subr.bf16.mxu1 %v3706_v0  ;;  %3205 = vmatprep.mubr.msk.bf16.mxu1 %vm3707_vm0, %v3706_v0  ;;  %v210_v4 = vpack.c.bf16 %v208_v1, %v208_v1  ;;  %vm211_vm2 = vcmask 48128   ;;  %v266_v7 = vld [vmem:[#allocation3 + $0x8] sm:$0xff]  ;;  %v267_v8 = vld [vmem:[#allocation3 + $0x10] sm:$0xff]  ;;  %vm275_vm5 = vcmask 130048  }
  0x36   : > { %s3820_s19 = scalar_select %p193_p5, %s3753_s16, 1  ;;  %3215 = vmatprep.subr.bf16.mxu0 %v3706_v0  ;;  %3217 = vmatprep.mubr.msk.bf16.mxu0 %vm3707_vm0, %v3706_v0  ;;  %v268_v9 = vld [vmem:[#allocation3 + $0x18] sm:$0xff]  ;;  %v274_v10 = vpack.c.bf16 %v267_v8, %v266_v7  ;;  %v269_v11 = vld [vmem:[#allocation3 + $0x20] sm:$0xff]  ;;  %v270_v17 = vld [vmem:[#allocation3 + $0x28] sm:$0xff]  ;;  %vm447_vm6 = vcmask 1043456   ;;  %v3708_v33 = vmov 0.0|0.0  }
  0x37   : > { %v217_v5 = vsel %vm215_vm1, %v210_v4, 0  ;;  %v273_v12 = vpack.c.bf16 %v269_v11, %v268_v9  ;;  %v271_v18 = vld [vmem:[#allocation3 + $0x30] sm:$0xff]  ;;  %v505_v29 = vld [vmem:[#allocation3 + $0x458] sm:$0xff]  ;;  %v587_v34 = vld [vmem:[#allocation3 + $0x460] sm:$0xff]  ;;  %v3855_v36 = vshrl.u32 %v320_v35, 7  ;;  %vm669_vm13 = vcmask 1045504  }
  0x38   : > { %s3071_s20 = sshll.u32 %s3820_s19, 4  ;;  %3204 = vmatpush3.bf16.msra.mxu1 %v217_v5  ;;  %v377_v25 = vpack.c.bf16 %v271_v18, %v270_v17  ;;  %v504_v28 = vld [vmem:[#allocation3 + $0x450] sm:$0xff]  ;;  %v440_v30 = vld [vmem:[#allocation3 + $0x38] sm:$0xff]  ;;  %v661_v61 = vld [vmem:[#allocation3 + $0x40] sm:$0xff]  ;;  %vm443_vm14 = vcmask 64512   ;;  %vm665_vm15 = vcmask 97280  }
  0x39   : > { %s197_s26 = scalar_lea.vmem %s4176_s0, %s3071_s20  ;;  %3209 = vmatprep.subr.bf16.mxu1 %v3706_v0  ;;  %3216 = vmatpush3.bf16.msra.mxu0 %v273_v12  ;;  %s202_s29 = scalar_lea.vmem %s4177_s1, %s3071_s20  ;;  %v442_v31 = vpack.c.bf16 %v440_v30, %v440_v30  ;;  %vm327_vm7 = vcmp.lt.s32.totalorder %v3855_v36, 1  ;;  %vm323_vm8 = vcmp.ne.s32.totalorder %v3855_v36, 0  ;;  %v3866_v52 = vadd.s32 8, %v3855_v36  ;;  %v662_v62 = vld [vmem:[#allocation3 + $0x48] sm:$0xf] }
  0x3a   : > { %v204_v2 = vld [vmem:[%s197_s26] sm:$0xff]  ;;  %v205_v3 = vld [vmem:[%s197_s26 + $0x8] sm:$0xff]  ;;  %3227 = vmatprep.subr.bf16.mxu0 %v3706_v0  ;;  %vm423_vm9 = vcmp.lt.s32.totalorder %v3855_v36, 7  ;;  %v664_v5 = vpack.c.bf16 %v662_v62, %v661_v61  ;;  %v723_v17 = vld [vmem:[#allocation3 + $0x68] sm:$0xff]  ;;  %s3709_s30 = smov 8   ;;  %s3710_s4 = smov 16  }
  0x3b   : > { %v209_v6 = vpack.c.bf16 %v205_v3, %v204_v2  ;;  %v206_v21 = vld [vmem:[%s202_s29] sm:$0xff]  ;;  %v207_v22 = vld [vmem:[%s202_s29 + $0x8] sm:$0xff]  ;;  %v449_v32 = vsel %vm447_vm6, %v442_v31, 0  ;;  %vm420_vm10 = vcmp.ne.s32.totalorder %v3866_v52, 15  ;;  %s191_s5 = sand.u32 1, %s3693_s13   ;;  %s3068_s6 = sshll.u32 %s3753_s16, 4 }
  0x3c   : > { %v3543_v27 = vpack.c.bf16 %v207_v22, %v206_v21  ;;  %v671_v12 = vsel %vm669_vm13, %v664_v5, 0  ;;  %s192_s7 = scalar_lea.vmem [#allocation6], %s191_s5  ;;  %s4134_s11 = scalar_lea.hbm %s4179_s3, %s3068_s6 }
  0x3d   : > { %3206 = vmatmul.mubr.msk.bf16.vlgmr.msra.gmra.mrb[0].mxu1 %vm211_vm2, %v209_v6  ;;  %s2923_s8 = sshll.u32 %s192_s7, 4  ;;  %s2911_s16 = scalar_lea.sflag [#allocation5], %s191_s5  ;;  %s4136_s8 = int_to_ptr.vmem [resolvable:$true] %s2923_s8 }
  0x3e   : > { %3211 = vmatprep.mubr.msk.bf16.mxu1 %vm3707_vm0, %v3706_v0  ;;  %3210 = vmatpush3.bf16.msra.mxu1 %v274_v10  ;;  %s3635_s17 = scalar_lea.vmem %s4136_s8, 16  ;;  %p4190_p9 = scmp.ne.s32.totalorder %s4183_s22, 0 }
  0x3f   : > { %3221 = vmatprep.subr.bf16.mxu1 %v3706_v0  ;;  %p3636_p6 = scmp.ne.s32.totalorder %s4136_s8, %s3635_s17  ;;  %s3711_s19 = smov [#allocation6]  }
  0x40   : > { %s3639_s20 = sshll.u32 %s3711_s19, 4  ;;  %s3640_s20 = int_to_ptr.vmem [resolvable:$false] %s3639_s20 }
  0x41   : > { %p3637_p10 = pnand %p3636_p6, %p4190_p9  ;;  %s3641_s24 = scalar_lea.vmem %s3640_s20, 32 }
  0x42   : > { %p3642_p2 = scmp.lt.s32.totalorder %s4136_s8, %s3640_s20  ;;  %p3643_p3 = scmp.lt.s32.totalorder %s3641_s24, %s3635_s17 }
  0x43   : > { %p3638_p12 = pneg %p3637_p10 }
  0x44   : > { %p3644_p4 = por %p3643_p3, %p3642_p2 }
  0x46   : > { %p3645_p7 = pnand %p3644_p4, %p3638_p12 }
 0x110   : > { %v253_v13 = vpop.f32.mrb[0].mxu1 }
 0x111   : > { %v262_v14 = vmul.f32 0.2, %v253_v13  ;;  %v3207_v15 = vpop.f32.mrb[1].mxu1  ;;  %vm260_vm3 = vcmp.ge.f32.partialorder %v253_v13, 0.0 }
 0x112   : > { %v256_v16 = vpop.f32.mrb[2].mxu1  ;;  %v722_v15 = vld [vmem:[#allocation3 + $0x60] sm:$0xff] }
 0x113   : > { %vm261_vm4 = vcmp.ge.f32.partialorder %v256_v16, 0.0  ;;  %v263_v19 = vmul.f32 0.2, %v256_v16  ;;  %v3208_v20 = vpop.f32.mrb[3].mxu1  ;;  %v264_v23 = vsel %vm260_vm3, %v253_v13, %v262_v14  ;;  %v720_v13 = vld [vmem:[#allocation3 + $0x50] sm:$0xff]  ;;  %v721_v14 = vld [vmem:[#allocation3 + $0x58] sm:$0xff]  ;;  %v727_v18 = vpack.c.bf16 %v723_v17, %v722_v15 }
 0x115   : > { %v265_v24 = vsel %vm261_vm4, %v256_v16, %v263_v19  ;;  %v728_v16 = vpack.c.bf16 %v721_v14, %v720_v13 }
 0x116   : > { %v272_v26 = vpack.c.bf16 %v265_v24, %v264_v23 }
 0x118   : > { %3212 = vmatmul.mubr.msk.bf16.vlgmr.msra.gmra.mrb[4].mxu1 %vm275_vm5, %v272_v26  ;;  %3218 = vmatmul.mubr.msk.bf16.vlgmr.msra.gmra.mrb[0].mxu0 %vm275_vm5, %v272_v26 }
 0x119   : > { %3222 = vmatpush3.bf16.msra.mxu1 %v377_v25  ;;  %3223 = vmatprep.mubr.msk.bf16.mxu1 %vm3707_vm0, %v3706_v0 }
 0x11a   : > { %3544 = vmatprep.subr.bf16.mxu1 %v3543_v27  ;;  %3229 = vmatprep.mubr.msk.bf16.mxu0 %vm3707_vm0, %v3706_v0 }
 0x11b   : > { %3228 = vmatpush3.bf16.msra.mxu0 %v449_v32 }
 0x11c   : > { %3247 = vmatprep.subr.bf16.mxu0 %v3706_v0 }
 0x120   : > { %3224 = vmatmul.mubr.msk.bf16.vlgmr.msra.gmra.mrb[8].mxu1 %vm275_vm5, %v272_v26 }
 0x121   : > { %3546 = vmatpush3.bf16.msra.mxu1 %v3543_v27  ;;  %3237 = vmatprep.mubr.msk.f32.mxu1 %vm275_vm5, %v504_v28 }
 0x122   : > { %3547 = vmatprep.subr.bf16.mxu1 %v3708_v33  ;;  %v724_v33 = vld [vmem:[#allocation3 + $0x70] sm:$0xff] }
 0x128   : > { %3238 = vmatmul.mubr.msk.f32.vlgmr.msra.gmra.mrb[12].mxu1 %vm275_vm5, %v505_v29 }
 0x129   : > { %3244 = vmatprep.mubr.msk.f32.mxu1 %vm3707_vm0, %v3706_v0  ;;  %3549 = vmatpush3.bf16.msra.mxu1 %v3543_v27 }
 0x12a   : > { %3253 = vmatprep.subr.bf16.mxu1 %v3706_v0 }
 0x12c   : > { %3245 = vmatmul.mubr.msk.f32.vlgmr.msra.gmra.mrb[14].mxu1 %vm275_vm5, %v587_v34  ;;  %v725_v34 = vld [vmem:[#allocation3 + $0x78] sm:$0xff] }
 0x12d   : > { %3255 = vmatprep.mubr.msk.bf16.mxu1 %vm3707_vm0, %v3706_v0  ;;  %3254 = vmatpush3.bf16.msra.mxu1 %v728_v16 }
 0x12e   : > { %3265 = vmatprep.subr.bf16.mxu1 %v3706_v0 }
 0x1eb   : > { %v313_v37 = vpop.f32.mrb[4].mxu1  ;;  %v370_v38 = vpop.f32.mrb[0].mxu0 }
 0x1ec   : > { %v3213_v39 = vpop.f32.mrb[5].mxu1  ;;  %v3219_v40 = vpop.f32.mrb[1].mxu0  ;;  %v325_v43 = vrot.slane %v313_v37, 7 }
 0x1ed   : > { %v316_v41 = vpop.f32.mrb[6].mxu1  ;;  %v373_v42 = vpop.f32.mrb[2].mxu0 }
 0x1ee   : > { %v326_v44 = vrot.slane %v316_v41, 7  ;;  %v3214_v45 = vpop.f32.mrb[7].mxu1  ;;  %v3220_v46 = vpop.f32.mrb[3].mxu0  ;;  %v820_v41 = vpack.c.bf16 %v725_v34, %v724_v33  ;;  %v995_v33 = vld [vmem:[#allocation3 + $0xc0] sm:$0xff] }
 0x1f0   : > { %v329_v47 = vsel %vm327_vm7, %v326_v44, %v325_v43  ;;  %v328_v48 = vsel %vm327_vm7, %v325_v43, %v326_v44  ;;  %v937_v43 = vld [vmem:[#allocation3 + $0x88] sm:$0xff]  ;;  %v938_v44 = vld [vmem:[#allocation3 + $0x90] sm:$0xf] }
 0x1f1   : > { %v334_v49 = vsel %vm323_vm8, %v329_v47, 0.0  ;;  %v374_v50 = vadd.f32 %v373_v42, %v328_v48  ;;  %v940_v45 = vpack.c.bf16 %v938_v44, %v937_v43  ;;  %v876_v48 = vld [vmem:[#allocation3 + $0x80] sm:$0xff] }
 0x1f2   : > { %v371_v51 = vadd.f32 %v370_v38, %v334_v49  ;;  %v878_v49 = vpack.c.bf16 %v876_v48, %v876_v48 }
 0x1f3   : > { %v412_v53 = vpop.f32.mrb[8].mxu1  ;;  %v945_v46 = vsel %vm669_vm13, %v940_v45, 0  ;;  %vm1125_vm13 = vcmp.ne.s32.totalorder %v3855_v36, 7 }
 0x1f4   : > { %v3225_v54 = vpop.f32.mrb[9].mxu1  ;;  %v421_v56 = vrot.slane %v412_v53, 1  ;;  %v993_v53 = vld [vmem:[#allocation3 + $0xb0] sm:$0xff] }
 0x1f5   : > { %v415_v55 = vpop.f32.mrb[10].mxu1 }
 0x1f6   : > { %v422_v57 = vrot.slane %v415_v55, 1  ;;  %v3226_v58 = vpop.f32.mrb[11].mxu1 }
 0x1f8   : > { %v424_v59 = vsel %vm423_vm9, %v421_v56, %v422_v57  ;;  %v425_v60 = vsel %vm423_vm9, %v422_v57, %v421_v56 }
 0x1f9   : > { %v431_v63 = vsel %vm420_vm10, %v425_v60, 0.0  ;;  %v432_v1 = vadd.f32 %v424_v59, %v371_v51  ;;  %v992_v51 = vld [vmem:[#allocation3 + $0xa8] sm:$0xff] }
 0x1fa   : > { %v433_v2 = vadd.f32 %v431_v63, %v374_v50  ;;  %v883_v50 = vsel %vm447_vm6, %v878_v49, 0  ;;  %v997_v54 = vpack.c.bf16 %v993_v53, %v992_v51 }
 0x1fb   : > { %vm434_vm11 = vcmp.ge.f32.partialorder %v432_v1, 0.0  ;;  %v436_v3 = vmul.f32 0.2, %v432_v1  ;;  %v3239_v4 = vpop.f32.mrb[12].mxu1 }
 0x1fc   : > { %vm435_vm12 = vcmp.ge.f32.partialorder %v433_v2, 0.0  ;;  %v437_v6 = vmul.f32 0.2, %v433_v2  ;;  %v578_v7 = vpop.f32.mrb[13].mxu1 }
 0x1fd   : > { %v438_v8 = vsel %vm434_vm11, %v432_v1, %v436_v3  ;;  %v663_v9 = vpack.c.bf16 %v3239_v4, %v578_v7 }
 0x1fe   : > { %v439_v10 = vsel %vm435_vm12, %v433_v2, %v437_v6 }
 0x1ff   : > { %v441_v11 = vpack.c.bf16 %v439_v10, %v438_v8  ;;  %v657_v19 = vpop.f32.mrb[14].mxu1 }
 0x200   : > { %v3246_v20 = vpop.f32.mrb[15].mxu1  ;;  %v939_v47 = vpack.c.bf16 %v657_v19, %v657_v19 }
 0x201   : > { %3230 = vmatmul.mubr.msk.bf16.vlgmr.msra.gmra.mrb[4].mxu0 %vm443_vm14, %v441_v11  ;;  %v990_v20 = vld [vmem:[#allocation3 + $0x98] sm:$0xff] }
 0x202   : > { %3248 = vmatpush3.bf16.msra.mxu0 %v671_v12  ;;  %3249 = vmatprep.mubr.msk.bf16.mxu0 %vm3707_vm0, %v3706_v0 }
 0x203   : > { %3259 = vmatprep.subr.bf16.mxu0 %v3706_v0 }
 0x209   : > { %3250 = vmatmul.mubr.msk.bf16.vlgmr.msra.gmra.mrb[8].mxu0 %vm665_vm15, %v663_v9 }
 0x20a   : > { %3261 = vmatprep.mubr.msk.bf16.mxu0 %vm3707_vm0, %v3706_v0  ;;  %3260 = vmatpush3.bf16.msra.mxu0 %v727_v18 }
 0x20b   : > { %3271 = vmatprep.subr.bf16.mxu0 %v3706_v0 }
 0x2d4   : > { %v485_v21 = vpop.f32.mrb[4].mxu0 }
 0x2d5   : > { %vm492_vm1 = vcmp.ge.f32.partialorder %v485_v21, 0.0  ;;  %v494_v22 = vmul.f32 0.2, %v485_v21  ;;  %v3231_v23 = vpop.f32.mrb[5].mxu0 }
 0x2d6   : > { %v488_v24 = vpop.f32.mrb[6].mxu0 }
 0x2d7   : > { %v496_v25 = vsel %vm492_vm1, %v485_v21, %v494_v22  ;;  %vm493_vm2 = vcmp.ge.f32.partialorder %v488_v24, 0.0  ;;  %v495_v26 = vmul.f32 0.2, %v488_v24  ;;  %v3232_v27 = vpop.f32.mrb[7].mxu0  ;;  %v991_v21 = vld [vmem:[#allocation3 + $0xa0] sm:$0xff] }
 0x2d8   : > { %498 = vst.msk [vmem:[#allocation2] sm:$0xff] %vm443_vm14, %v496_v25 }
 0x2d9   : > { %v497_v28 = vsel %vm493_vm2, %v488_v24, %v495_v26  ;;  %vm1210_vm2 = vcmask 195584  }
 0x2da   : > { %499 = vst.msk [vmem:[#allocation2 + $0x8] sm:$0xff] %vm443_vm14, %v497_v28 }
 0x2dc   : > { %v707_v29 = vpop.f32.mrb[8].mxu0 }
 0x2dd   : > { %v716_v30 = vmul.f32 0.2, %v707_v29  ;;  %v3251_v31 = vpop.f32.mrb[9].mxu0  ;;  %vm714_vm3 = vcmp.ge.f32.partialorder %v707_v29, 0.0 }
 0x2de   : > { %v710_v32 = vpop.f32.mrb[10].mxu0 }
 0x2df   : > { %vm715_vm4 = vcmp.ge.f32.partialorder %v710_v32, 0.0  ;;  %v717_v37 = vmul.f32 0.2, %v710_v32  ;;  %v3252_v38 = vpop.f32.mrb[11].mxu0  ;;  %v718_v39 = vsel %vm714_vm3, %v707_v29, %v716_v30  ;;  %v998_v29 = vpack.c.bf16 %v991_v21, %v990_v20 }
 0x2e1   : > { %v719_v40 = vsel %vm715_vm4, %v710_v32, %v717_v37  ;;  %v994_v32 = vld [vmem:[#allocation3 + $0xb8] sm:$0xff]  ;;  %v1134_v37 = vld [vmem:[#allocation3 + $0xc8] sm:$0xff]  ;;  %vm1556_vm4 = vcmask 31744  }
 0x2e2   : > { %v726_v42 = vpack.c.bf16 %v719_v40, %v718_v39  ;;  %v1084_v34 = vpack.c.bf16 %v995_v33, %v994_v32  ;;  %v1136_v38 = vpack.c.bf16 %v1134_v37, %v1134_v37  ;;  %v3934_v45 = vld [vmem:[#allocation2] ss:$2 sm:$0xff]  ;;  %v1203_v32 = vld [vmem:[#allocation3 + $0x108] sm:$0xff] }
 0x2e3   : > { %v1204_v33 = vld [vmem:[#allocation3 + $0x110] sm:$0xff] }
 0x2e4   : > { %3256 = vmatmul.mubr.msk.bf16.vlgmr.msra.gmra.mrb[16].mxu1 %vm275_vm5, %v726_v42  ;;  %3262 = vmatmul.mubr.msk.bf16.vlgmr.msra.gmra.mrb[12].mxu0 %vm275_vm5, %v726_v42  ;;  %v1141_v39 = vsel %vm447_vm6, %v1136_v38, 0 }
 0x2e5   : > { %3266 = vmatpush3.bf16.msra.mxu1 %v820_v41  ;;  %3267 = vmatprep.mubr.msk.bf16.mxu1 %vm3707_vm0, %v3706_v0 }
 0x2e6   : > { %3277 = vmatprep.subr.bf16.mxu1 %v3706_v0  ;;  %3273 = vmatprep.mubr.msk.bf16.mxu0 %vm3707_vm0, %v3706_v0 }
 0x2e7   : > { %3272 = vmatpush3.bf16.msra.mxu0 %v883_v50 }
 0x2e8   : > { %3283 = vmatprep.subr.bf16.mxu0 %v3706_v0 }
 0x2ec   : > { %3268 = vmatmul.mubr.msk.bf16.vlgmr.msra.gmra.mrb[20].mxu1 %vm275_vm5, %v726_v42 }
 0x2ed   : > { %3278 = vmatpush3.bf16.msra.mxu1 %v945_v46  ;;  %3279 = vmatprep.mubr.msk.bf16.mxu1 %vm3707_vm0, %v3706_v0  ;;  %v3936_v46 = vld [vmem:[#allocation2 + $0x1] ss:$2 sm:$0xff] }
 0x2ee   : > { %3289 = vmatprep.subr.bf16.mxu1 %v3706_v0 }
 0x2f4   : > { %3280 = vmatmul.mubr.msk.bf16.vlgmr.msra.gmra.mrb[24].mxu1 %vm665_vm15, %v939_v47 }
 0x2f5   : > { %3291 = vmatprep.mubr.msk.bf16.mxu1 %vm3707_vm0, %v3706_v0  ;;  %3290 = vmatpush3.bf16.msra.mxu1 %v997_v54 }
 0x2f6   : > { %3301 = vmatprep.subr.bf16.mxu1 %v3706_v0 }
 0x3b7   : > { %v766_v55 = vpop.f32.mrb[16].mxu1  ;;  %v813_v56 = vpop.f32.mrb[12].mxu0 }
 0x3b8   : > { %v3257_v57 = vpop.f32.mrb[17].mxu1  ;;  %v3263_v58 = vpop.f32.mrb[13].mxu0  ;;  %v773_v61 = vrot.slane %v766_v55, 7 }
 0x3b9   : > { %v769_v59 = vpop.f32.mrb[18].mxu1  ;;  %v816_v60 = vpop.f32.mrb[14].mxu0 }
 0x3ba   : > { %v774_v62 = vrot.slane %v769_v59, 7  ;;  %v3258_v63 = vpop.f32.mrb[19].mxu1  ;;  %v3264_v1 = vpop.f32.mrb[15].mxu0 }
 0x3bc   : > { %v776_v2 = vsel %vm327_vm7, %v774_v62, %v773_v61  ;;  %v775_v3 = vsel %vm327_vm7, %v773_v61, %v774_v62 }
 0x3bd   : > { %v777_v4 = vsel %vm323_vm8, %v776_v2, 0.0  ;;  %v817_v5 = vadd.f32 %v816_v60, %v775_v3 }
 0x3be   : > { %v814_v6 = vadd.f32 %v813_v56, %v777_v4 }
 0x3bf   : > { %v855_v7 = vpop.f32.mrb[20].mxu1 }
 0x3c0   : > { %v3269_v8 = vpop.f32.mrb[21].mxu1  ;;  %v862_v10 = vrot.slane %v855_v7, 1 }
 0x3c1   : > { %v858_v9 = vpop.f32.mrb[22].mxu1 }
 0x3c2   : > { %v863_v11 = vrot.slane %v858_v9, 1  ;;  %v3270_v12 = vpop.f32.mrb[23].mxu1 }
 0x3c3   : > { %v1196_v12 = vld [vmem:[#allocation3 + $0xd0] sm:$0xff] }
 0x3c4   : > { %v864_v13 = vsel %vm423_vm9, %v862_v10, %v863_v11  ;;  %v865_v14 = vsel %vm423_vm9, %v863_v11, %v862_v10 }
 0x3c5   : > { %v867_v15 = vsel %vm420_vm10, %v865_v14, 0.0  ;;  %v868_v16 = vadd.f32 %v864_v13, %v814_v6  ;;  %v1197_v13 = vld [vmem:[#allocation3 + $0xd8] sm:$0xff]  ;;  %v1199_v14 = vld [vmem:[#allocation3 + $0xe8] sm:$0xff] }
 0x3c6   : > { %v869_v17 = vadd.f32 %v867_v15, %v817_v5  ;;  %v1208_v15 = vpack.c.bf16 %v1197_v13, %v1196_v12  ;;  %v1499_v12 = vld [vmem:[#allocation3 + $0x150] sm:$0xff] }
 0x3c7   : > { %vm870_vm7 = vcmp.ge.f32.partialorder %v868_v16, 0.0  ;;  %v872_v18 = vmul.f32 0.2, %v868_v16  ;;  %v981_v19 = vpop.f32.mrb[24].mxu1 }
 0x3c8   : > { %vm871_vm11 = vcmp.ge.f32.partialorder %v869_v17, 0.0  ;;  %v873_v22 = vmul.f32 0.2, %v869_v17  ;;  %vm987_vm12 = vcmp.ge.f32.partialorder %v981_v19, 0.0  ;;  %v988_v23 = vmul.f32 0.2, %v981_v19 }
 0x3c9   : > { %v874_v24 = vsel %vm870_vm7, %v868_v16, %v872_v18  ;;  %v3281_v25 = vpop.f32.mrb[25].mxu1  ;;  %v1200_v16 = vld [vmem:[#allocation3 + $0xf0] sm:$0xff]  ;;  %v1198_v18 = vld [vmem:[#allocation3 + $0xe0] sm:$0xff] }
 0x3ca   : > { %v875_v26 = vsel %vm871_vm11, %v869_v17, %v873_v22  ;;  %v989_v27 = vsel %vm987_vm12, %v981_v19, %v988_v23  ;;  %v984_v28 = vpop.f32.mrb[26].mxu1  ;;  %v1206_v17 = vpack.c.bf16 %v1200_v16, %v1199_v14  ;;  %v1201_v19 = vld [vmem:[#allocation3 + $0xf8] sm:$0xff]  ;;  %v1209_v20 = vpack.c.bf16 %v1198_v18, %v1198_v18 }
 0x3cb   : > { %v877_v30 = vpack.c.bf16 %v875_v26, %v874_v24  ;;  %v996_v52 = vpack.c.bf16 %v989_v27, %v989_v27  ;;  %v3282_v31 = vpop.f32.mrb[27].mxu1  ;;  %v1207_v21 = vpack.c.bf16 %v1201_v19, %v1201_v19  ;;  %vm1815_vm11 = vcmask 261120  }
 0x3cc   : > { %v1215_v22 = vsel %vm447_vm6, %v1209_v20, 0  ;;  %v1202_v31 = vld [vmem:[#allocation3 + $0x100] sm:$0xff]  ;;  %vm2091_vm12 = vcmask 257024  }
 0x3cd   : > { %3274 = vmatmul.mubr.msk.bf16.vlgmr.msra.gmra.mrb[16].mxu0 %vm443_vm14, %v877_v30  ;;  %3292 = vmatmul.mubr.msk.bf16.vlgmr.msra.gmra.mrb[28].mxu1 %vm275_vm5, %v996_v52  ;;  %v1260_v23 = vsel %vm447_vm6, %v1207_v21, 0 }
 0x3ce   : > { %3284 = vmatpush3.bf16.msra.mxu0 %v998_v29  ;;  %3285 = vmatprep.mubr.msk.bf16.mxu0 %vm3707_vm0, %v3706_v0 }
 0x3cf   : > { %3295 = vmatprep.subr.bf16.mxu0 %v3706_v0  ;;  %3303 = vmatprep.mubr.msk.bf16.mxu1 %vm3707_vm0, %v3706_v0 }
 0x3d0   : > { %3302 = vmatpush3.bf16.msra.mxu1 %v1141_v39  ;;  %v1302_v39 = vpack.c.bf16 %v1203_v32, %v1202_v31 }
 0x3d1   : > { %3315 = vmatprep.subr.bf16.mxu1 %v3706_v0 }
 0x3d5   : > { %3286 = vmatmul.mubr.msk.bf16.vlgmr.msra.gmra.mrb[20].mxu0 %vm275_vm5, %v996_v52 }
 0x3d6   : > { %3296 = vmatpush3.bf16.msra.mxu0 %v1084_v34  ;;  %3297 = vmatprep.mubr.msk.bf16.mxu0 %vm3707_vm0, %v3706_v0 }
 0x3d7   : > { %3307 = vmatprep.subr.bf16.mxu0 %v3706_v0 }
 0x3dd   : > { %3298 = vmatmul.mubr.msk.bf16.vlgmr.msra.gmra.mrb[24].mxu0 %vm275_vm5, %v996_v52  ;;  %v503_v52 = vmax.f32 %v3934_v45, %v3936_v46  ;;  %v1355_v45 = vld [vmem:[#allocation3 + $0x128] sm:$0xff] }
 0x3de   : > { %3311 = vmatprep.mubr.msk.bf16.mxu0 %vm3707_vm0, %v3706_v0  ;;  %3308 = vmatpush3.bf16.msra.mxu0 %v1208_v15 }
 0x3df   : > { %3309 = vmatprep.subr.bf16.mxu0 %v3706_v0 }
 0x3e2   : > { %3310 = vmatpush3.bf16.msra.mxu0 %v1215_v22 }
 0x3e3   : > { %3323 = vmatprep.subr.bf16.mxu0 %v3706_v0 }
 0x4a0   : > { %v919_v40 = vpop.f32.mrb[16].mxu0  ;;  %v1078_v41 = vpop.f32.mrb[28].mxu1 }
 0x4a1   : > { %vm926_vm9 = vcmp.ge.f32.partialorder %v919_v40, 0.0  ;;  %v928_v42 = vmul.f32 0.2, %v919_v40  ;;  %v3275_v43 = vpop.f32.mrb[17].mxu0  ;;  %v3293_v44 = vpop.f32.mrb[29].mxu1 }
 0x4a2   : > { %v922_v47 = vpop.f32.mrb[18].mxu0  ;;  %v1081_v48 = vpop.f32.mrb[30].mxu1  ;;  %v1353_v43 = vld [vmem:[#allocation3 + $0x118] sm:$0xff]  ;;  %v1354_v44 = vld [vmem:[#allocation3 + $0x120] sm:$0xff] }
 0x4a3   : > { %v930_v49 = vsel %vm926_vm9, %v919_v40, %v928_v42  ;;  %vm927_vm10 = vcmp.ge.f32.partialorder %v922_v47, 0.0  ;;  %v929_v50 = vmul.f32 0.2, %v922_v47  ;;  %v3276_v51 = vpop.f32.mrb[19].mxu0  ;;  %v3294_v53 = vpop.f32.mrb[31].mxu1  ;;  %v1361_v46 = vpack.c.bf16 %v1354_v44, %v1353_v43  ;;  %v1500_v44 = vld [vmem:[#allocation3 + $0x158] sm:$0xff] }
 0x4a4   : > { %932 = vst.msk [vmem:[#allocation2] sm:$0xff] %vm443_vm14, %v930_v49  ;;  %v3037_v43 = vadd.s32 4294967295, %v3855_v36  ;;  %vm2159_vm9 = vcmask 1041408  }
 0x4a5   : > { %v931_v54 = vsel %vm927_vm10, %v922_v47, %v929_v50  ;;  %v1356_v47 = vld [vmem:[#allocation3 + $0x130] sm:$0xff]  ;;  %vm2156_vm10 = vcmask 15360  }
 0x4a6   : > { %933 = vst.msk [vmem:[#allocation2 + $0x8] sm:$0xff] %vm443_vm14, %v931_v54  ;;  %v1360_v48 = vpack.c.bf16 %v1356_v47, %v1355_v45  ;;  %v1501_v45 = vld [vmem:[#allocation3 + $0x160] sm:$0xff] }
 0x4a7   : > { %v1505_v47 = vpack.c.bf16 %v1501_v45, %v1500_v44  ;;  %v2099_v45 = vld [vmem:[#allocation3 + $0x1f0] sm:$0xff] }
 0x4a8   : > { %v1036_v55 = vpop.f32.mrb[20].mxu0 }
 0x4a9   : > { %v1042_v56 = vrot.slane %v1036_v55, 7  ;;  %v3287_v57 = vpop.f32.mrb[21].mxu0 }
 0x4aa   : > { %v1039_v58 = vpop.f32.mrb[22].mxu0 }
 0x4ab   : > { %v1043_v59 = vsel %vm323_vm8, %v1042_v56, 0.0  ;;  %v3288_v60 = vpop.f32.mrb[23].mxu0 }
 0x4ac   : > { %v1079_v61 = vadd.f32 %v1078_v41, %v1043_v59  ;;  %v1303_v41 = vpack.c.bf16 %v1204_v33, %v1204_v33  ;;  %v1502_v33 = vld [vmem:[#allocation3 + $0x168] sm:$0xff] }
 0x4ad   : > { %v934_v62 = vld [vmem:[#allocation2] ss:$2 sm:$0xff]  ;;  %v935_v63 = vld [vmem:[#allocation2 + $0x1] ss:$2 sm:$0xff] }
 0x4ae   : > { %v936_v1 = vmax.f32 %v934_v62, %v935_v63  ;;  %v1305_v42 = vsel %vm447_vm6, %v1303_v41, 0 }
 0x4b0   : > { %1187 = vrot.lane.b32.xlu0 %v936_v1, %s3709_s30  ;;  %v1119_v2 = vpop.f32.mrb[24].mxu0 }
 0x4b1   : > { %v1126_v3 = vrot.slane %v1119_v2, 1  ;;  %v3299_v4 = vpop.f32.mrb[25].mxu0 }
 0x4b2   : > { %v1122_v5 = vpop.f32.mrb[26].mxu0 }
 0x4b3   : > { %v1129_v6 = vsel %vm1125_vm13, %v1126_v3, 0.0  ;;  %v3300_v7 = vpop.f32.mrb[27].mxu0  ;;  %v1357_v5 = vld [vmem:[#allocation3 + $0x138] sm:$0xff] }
 0x4b4   : > { %v1130_v8 = vadd.f32 %v1129_v6, %v1079_v61  ;;  %v1358_v6 = vld [vmem:[#allocation3 + $0x140] sm:$0xff] }
 0x4b6   : > { %vm1131_vm15 = vcmp.ge.f32.partialorder %v1130_v8, 0.0  ;;  %v1132_v9 = vmul.f32 0.2, %v1130_v8 }
 0x4b8   : > { %v1133_v10 = vsel %vm1131_vm15, %v1130_v8, %v1132_v9  ;;  %v1447_v9 = vpack.c.bf16 %v1358_v6, %v1357_v5  ;;  %vm2427_vm15 = vcmask 523264  }
 0x4b9   : > { %v1135_v11 = vpack.c.bf16 %v1133_v10, %v1133_v10 }
 0x4bb   : > { %3304 = vmatmul.mubr.msk.bf16.vlgmr.msra.gmra.mrb[32].mxu1 %vm443_vm14, %v1135_v11  ;;  %v1498_v11 = vld [vmem:[#allocation3 + $0x148] sm:$0xff] }
 0x4bc   : > { %3319 = vmatprep.mubr.msk.bf16.mxu1 %vm3707_vm0, %v3706_v0  ;;  %3316 = vmatpush3.bf16.msra.mxu1 %v1206_v17  ;;  %v1506_v13 = vpack.c.bf16 %v1499_v12, %v1498_v11  ;;  %v1803_v11 = vld [vmem:[#allocation3 + $0x1a0] sm:$0xff] }
 0x4bd   : > { %3317 = vmatprep.subr.bf16.mxu1 %v3706_v0 }
 0x4c0   : > { %3318 = vmatpush3.bf16.msra.mxu1 %v1260_v23 }
 0x4c1   : > { %3331 = vmatprep.subr.bf16.mxu1 %v3706_v0 }
 0x522   : > { %v1188_v30 = vpop.permute.xlu0 %1187 }
 0x523   : > { %v1194_v34 = vsel %vm443_vm14, %v503_v52, %v1188_v30 }
 0x58e   : > { %v1177_v24 = vpop.f32.mrb[32].mxu1 }
 0x58f   : > { %vm1183_vm1 = vcmp.ge.f32.partialorder %v1177_v24, 0.0  ;;  %v1184_v25 = vmul.f32 0.2, %v1177_v24  ;;  %v3305_v26 = vpop.f32.mrb[33].mxu1 }
 0x590   : > { %v1180_v27 = vpop.f32.mrb[34].mxu1 }
 0x591   : > { %v3306_v28 = vpop.f32.mrb[35].mxu1  ;;  %v1185_v29 = vsel %vm1183_vm1, %v1177_v24, %v1184_v25 }
 0x592   : > { %1191 = vrot.lane.b32.xlu0 %v1185_v29, %s3710_s4 }
 0x604   : > { %v1192_v37 = vpop.permute.xlu0 %1191 }
 0x605   : > { %v1195_v38 = vsel %vm275_vm5, %v1194_v34, %v1192_v37  ;;  %v1503_v34 = vld [vmem:[#allocation3 + $0x170] sm:$0xff] }
 0x606   : > { %v1205_v40 = vpack.c.bf16 %v1195_v38, %v1195_v38 }
 0x608   : > { %3312 = vmatmul.mubr.msk.bf16.vlgmr.msra.gmra.mrb[28].mxu0 %vm1210_vm2, %v1205_v40  ;;  %3320 = vmatmul.mubr.msk.bf16.vlgmr.msra.gmra.mrb[36].mxu1 %vm1210_vm2, %v1205_v40 }
 0x609   : > { %3324 = vmatpush3.bf16.msra.mxu0 %v1302_v39  ;;  %3327 = vmatprep.mubr.msk.bf16.mxu0 %vm3707_vm0, %v3706_v0 }
 0x60a   : > { %3325 = vmatprep.subr.bf16.mxu0 %v3706_v0  ;;  %3333 = vmatprep.mubr.msk.bf16.mxu1 %vm3707_vm0, %v3706_v0 }
 0x60b   : > { %3332 = vmatpush3.bf16.msra.mxu1 %v1361_v46 }
 0x60c   : > { %3343 = vmatprep.subr.bf16.mxu1 %v3706_v0 }
 0x60d   : > { %3326 = vmatpush3.bf16.msra.mxu0 %v1305_v42  ;;  %v1551_v42 = vand.u32 127, %v320_v35 }
 0x60e   : > { %3337 = vmatprep.subr.bf16.mxu0 %v3706_v0 }
 0x610   : > { %3328 = vmatmul.mubr.msk.bf16.vlgmr.msra.gmra.mrb[32].mxu0 %vm1210_vm2, %v1205_v40  ;;  %v1673_v40 = vpack.c.bf16 %v1503_v34, %v1502_v33  ;;  %vm2705_vm2 = vcmask 517120  }
 0x611   : > { %3339 = vmatprep.mubr.msk.bf16.mxu0 %vm3707_vm0, %v3706_v0  ;;  %3338 = vmatpush3.bf16.msra.mxu0 %v1360_v48 }
 0x612   : > { %3349 = vmatprep.subr.bf16.mxu0 %v3706_v0 }
 0x6db   : > { %v1251_v49 = vpop.f32.mrb[28].mxu0  ;;  %v1296_v50 = vpop.f32.mrb[36].mxu1 }
 0x6dc   : > { %v1257_v51 = vrot.slane %v1251_v49, 7  ;;  %v3313_v53 = vpop.f32.mrb[29].mxu0  ;;  %v3321_v54 = vpop.f32.mrb[37].mxu1 }
 0x6dd   : > { %v1254_v55 = vpop.f32.mrb[30].mxu0  ;;  %v1299_v56 = vpop.f32.mrb[38].mxu1 }
 0x6de   : > { %v1258_v57 = vsel %vm323_vm8, %v1257_v51, 0.0  ;;  %v3314_v58 = vpop.f32.mrb[31].mxu0  ;;  %v3322_v59 = vpop.f32.mrb[39].mxu1  ;;  %v1714_v51 = vadd.s32 1, %v3855_v36  ;;  %v1798_v36 = vld [vmem:[#allocation3 + $0x178] sm:$0xff] }
 0x6df   : > { %v1297_v60 = vadd.f32 %v1296_v50, %v1258_v57  ;;  %v1799_v58 = vld [vmem:[#allocation3 + $0x180] sm:$0xff] }
 0x6e0   : > { %vm1715_vm7 = vcmp.eq.s32.totalorder %v1551_v42, %v1714_v51  ;;  %v1813_v59 = vpack.c.bf16 %v1799_v58, %v1798_v36 }
 0x6e1   : > { %v4015_v57 = vsel %vm1715_vm7, 1.0, %v3706_v0 }
 0x6e3   : > { %v1341_v61 = vpop.f32.mrb[32].mxu0 }
 0x6e4   : > { %v1347_v62 = vrot.slane %v1341_v61, 1  ;;  %v3329_v63 = vpop.f32.mrb[33].mxu0  ;;  %v1801_v61 = vld [vmem:[#allocation3 + $0x190] sm:$0xff] }
 0x6e5   : > { %v1344_v1 = vpop.f32.mrb[34].mxu0 }
 0x6e6   : > { %v1348_v2 = vsel %vm1125_vm13, %v1347_v62, 0.0  ;;  %v3330_v3 = vpop.f32.mrb[35].mxu0 }
 0x6e7   : > { %v1349_v4 = vadd.f32 %v1348_v2, %v1297_v60  ;;  %v1800_v60 = vld [vmem:[#allocation3 + $0x188] sm:$0xff] }
 0x6e8   : > { %v1814_v62 = vpack.c.bf16 %v1801_v61, %v1800_v60  ;;  %v2102_v60 = vld [vmem:[#allocation3 + $0x208] sm:$0xff]  ;;  %v2103_v61 = vld [vmem:[#allocation3 + $0x210] sm:$0xff] }
 0x6e9   : > { %vm1350_vm14 = vcmp.ge.f32.partialorder %v1349_v4, 0.0  ;;  %v1351_v7 = vmul.f32 0.2, %v1349_v4 }
 0x6eb   : > { %v1352_v8 = vsel %vm1350_vm14, %v1349_v4, %v1351_v7 }
 0x6ec   : > { %v1359_v10 = vpack.c.bf16 %v1352_v8, %v1352_v8 }
 0x6ee   : > { %3334 = vmatmul.mubr.msk.bf16.vlgmr.msra.gmra.mrb[40].mxu1 %vm275_vm5, %v1359_v10  ;;  %3340 = vmatmul.mubr.msk.bf16.vlgmr.msra.gmra.mrb[36].mxu0 %vm275_vm5, %v1359_v10 }
 0x6ef   : > { %3344 = vmatpush3.bf16.msra.mxu1 %v1447_v9  ;;  %3345 = vmatprep.mubr.msk.bf16.mxu1 %vm3707_vm0, %v3706_v0 }
 0x6f0   : > { %3351 = vmatprep.mubr.msk.bf16.mxu0 %vm3707_vm0, %v3706_v0  ;;  %3355 = vmatprep.subr.mxu1 %v3706_v0 }
 0x6f1   : > { %3350 = vmatpush3.bf16.msra.mxu0 %v1506_v13 }
 0x6f2   : > { %3366 = vmatprep.subr.bf16.mxu0 %v3706_v0 }
 0x6f6   : > { %3346 = vmatmul.mubr.msk.bf16.vlgmr.msra.gmra.mrb[44].mxu1 %vm275_vm5, %v1359_v10  ;;  %v1802_v10 = vld [vmem:[#allocation3 + $0x198] sm:$0xff] }
 0x6f7   : > { %3357 = vmatprep.mubr.msk.f32.mxu1 %vm3707_vm0, %v3706_v0 }
 0x7c1   : > { %v1399_v14 = vpop.f32.mrb[40].mxu1  ;;  %v1441_v15 = vpop.f32.mrb[36].mxu0 }
 0x7c2   : > { %v1405_v16 = vrot.slane %v1399_v14, 7  ;;  %v3335_v17 = vpop.f32.mrb[41].mxu1  ;;  %v3341_v18 = vpop.f32.mrb[37].mxu0  ;;  %v1811_v14 = vpack.c.bf16 %v1803_v11, %v1802_v10 }
 0x7c3   : > { %v1402_v19 = vpop.f32.mrb[42].mxu1  ;;  %v1444_v20 = vpop.f32.mrb[38].mxu0  ;;  %v1805_v17 = vld [vmem:[#allocation3 + $0x1b0] sm:$0xff] }
 0x7c4   : > { %v1406_v21 = vsel %vm323_vm8, %v1405_v16, 0.0  ;;  %v3336_v22 = vpop.f32.mrb[43].mxu1  ;;  %v3342_v23 = vpop.f32.mrb[39].mxu0  ;;  %vm1553_vm8 = vcmp.eq.s32.totalorder %v1551_v42, %v3037_v43  ;;  %v1804_v16 = vld [vmem:[#allocation3 + $0x1a8] sm:$0xff]  ;;  %v1806_v19 = vld [vmem:[#allocation3 + $0x1b8] sm:$0xff]  ;;  %v1807_v20 = vld [vmem:[#allocation3 + $0x1c0] sm:$0xff] }
 0x7c5   : > { %v1442_v24 = vadd.f32 %v1441_v15, %v1406_v21  ;;  %v3999_v46 = vsel %vm1553_vm8, 1.0, %v3706_v0  ;;  %v1812_v18 = vpack.c.bf16 %v1805_v17, %v1804_v16  ;;  %v1972_v21 = vpack.c.bf16 %v1807_v20, %v1806_v19  ;;  %v1808_v23 = vld [vmem:[#allocation3 + $0x1c8] sm:$0xff]  ;;  %v2097_v42 = vld [vmem:[#allocation3 + $0x1e0] sm:$0xff] }
 0x7c6   : > { %v2098_v43 = vld [vmem:[#allocation3 + $0x1e8] sm:$0xff] }
 0x7c7   : > { %v2396_v16 = vld [vmem:[#allocation3 + $0x248] sm:$0xff] }
 0x7c9   : > { %v1482_v25 = vpop.f32.mrb[44].mxu1 }
 0x7ca   : > { %v1488_v26 = vrot.slane %v1482_v25, 1  ;;  %v3347_v27 = vpop.f32.mrb[45].mxu1 }
 0x7cb   : > { %v1485_v28 = vpop.f32.mrb[46].mxu1 }
 0x7cc   : > { %v1489_v29 = vsel %vm1125_vm13, %v1488_v26, 0.0  ;;  %v3348_v30 = vpop.f32.mrb[47].mxu1 }
 0x7cd   : > { %v1490_v52 = vadd.f32 %v1489_v29, %v1442_v24  ;;  %v1809_v24 = vld [vmem:[#allocation3 + $0x1d0] sm:$0xff] }
 0x7ce   : > { %v1973_v28 = vpack.c.bf16 %v1809_v24, %v1808_v23 }
 0x7cf   : > { %vm1491_vm3 = vcmp.ge.f32.partialorder %v1490_v52, 0.0  ;;  %v1492_v31 = vmul.f32 0.2, %v1490_v52 }
 0x7d1   : > { %v1493_v32 = vsel %vm1491_vm3, %v1490_v52, %v1492_v31  ;;  %vm2908_vm3 = vcmask 32768  }
 0x7d2   : > { %1494 = vst.msk [vmem:[#allocation2] sm:$0xff] %vm275_vm5, %v1493_v32 }
 0x7d9   : > { %v1495_v37 = vld [vmem:[#allocation2] ss:$2 sm:$0xf]  ;;  %v1496_v38 = vld [vmem:[#allocation2 + $0x1] ss:$2 sm:$0xf] }
 0x7da   : > { %v1497_v39 = vmax.f32 %v1495_v37, %v1496_v38 }
 0x7dc   : > { %v1504_v41 = vpack.c.bf16 %v1497_v39, %v1497_v39 }
 0x7de   : > { %3352 = vmatmul.mubr.msk.bf16.vlgmr.msra.gmra.mrb[40].mxu0 %vm275_vm5, %v1504_v41 }
 0x7df   : > { %3367 = vmatpush3.bf16.msra.mxu0 %v1673_v40  ;;  %3368 = vmatprep.mubr.msk.bf16.mxu0 %vm3707_vm0, %v3706_v0 }
 0x7e0   : > { %3377 = vmatprep.subr.bf16.mxu0 %v3706_v0 }
 0x7e6   : > { %3369 = vmatmul.mubr.msk.bf16.vlgmr.msra.gmra.mrb[44].mxu0 %vm275_vm5, %v1504_v41 }
 0x7e7   : > { %3381 = vmatprep.mubr.msk.bf16.mxu0 %vm3707_vm0, %v3706_v0  ;;  %3378 = vmatpush3.bf16.msra.mxu0 %v1813_v59 }
 0x7e8   : > { %3379 = vmatprep.subr.bf16.mxu0 %v3706_v0 }
 0x7eb   : > { %3380 = vmatpush3.bf16.msra.mxu0 %v1814_v62  ;;  %v2110_v62 = vpack.c.bf16 %v2103_v61, %v2102_v60 }
 0x7ec   : > { %3390 = vmatprep.subr.bf16.mxu0 %v3706_v0 }
 0x8b1   : > { %v1544_v48 = vpop.f32.mrb[40].mxu0 }
 0x8b2   : > { %v3353_v49 = vpop.f32.mrb[41].mxu0  ;;  %3356 = vmatpush3.msk.msra.mxu1 %vm447_vm6, %v1544_v48 }
 0x8b3   : > { %v1547_v50 = vpop.f32.mrb[42].mxu0  ;;  %3358 = vmatmul.mubr.msk.f32.vlgmr.msra.gmra.mrb[48].mxu1 %vm1556_vm4, %v3999_v46  ;;  %3360 = vmatprep.subr.bf16.mxu1 %v3706_v0 }
 0x8b4   : > { %v3354_v35 = vpop.f32.mrb[43].mxu0  ;;  %3361 = vmatpush3.bf16.msra.mxu1 %v1505_v47  ;;  %3362 = vmatprep.mubr.msk.bf16.mxu1 %vm3707_vm0, %v3706_v0  ;;  %v2112_v47 = vpack.c.bf16 %v2099_v45, %v2098_v43  ;;  %v2412_v43 = vld [vmem:[#allocation3 + $0x2c8] sm:$0xff] }
 0x8b5   : > { %3372 = vmatprep.subr.mxu1 %v3706_v0 }
 0x8b7   : > { %3363 = vmatmul.mubr.msk.bf16.vlgmr.msra.gmra.mrb[52].mxu1 %vm275_vm5, %v1504_v41  ;;  %v2096_v41 = vld [vmem:[#allocation3 + $0x1d8] sm:$0xff] }
 0x8b8   : > { %3374 = vmatprep.mubr.msk.f32.mxu1 %vm3707_vm0, %v3706_v0  ;;  %v2111_v44 = vpack.c.bf16 %v2097_v42, %v2096_v41 }
 0x8b9   : > { %v1708_v53 = vpop.f32.mrb[44].mxu0 }
 0x8ba   : > { %v3370_v54 = vpop.f32.mrb[45].mxu0  ;;  %3373 = vmatpush3.msk.msra.mxu1 %vm447_vm6, %v1708_v53  ;;  %v2100_v53 = vld [vmem:[#allocation3 + $0x1f8] sm:$0xff] }
 0x8bb   : > { %v1711_v55 = vpop.f32.mrb[46].mxu0  ;;  %3385 = vmatprep.subr.mxu1 %v3706_v0  ;;  %v2101_v54 = vld [vmem:[#allocation3 + $0x200] sm:$0xff] }
 0x8bc   : > { %v3371_v56 = vpop.f32.mrb[47].mxu0  ;;  %v2109_v58 = vpack.c.bf16 %v2101_v54, %v2100_v53  ;;  %v2402_v53 = vld [vmem:[#allocation3 + $0x278] sm:$0xff]  ;;  %v2403_v54 = vld [vmem:[#allocation3 + $0x280] sm:$0xff] }
 0x8bf   : > { %3375 = vmatmul.mubr.msk.f32.vlgmr.msra.gmra.mrb[50].mxu1 %vm1556_vm4, %v4015_v57 }
 0x8c0   : > { %3387 = vmatprep.mubr.msk.f32.mxu1 %vm3707_vm0, %v3706_v0 }
 0x986   : > { %v1629_v63 = vpop.f32.mrb[48].mxu1 }
 0x987   : > { %v3359_v1 = vpop.f32.mrb[49].mxu1 }
 0x988   : > { %v2105_v1 = vld [vmem:[#allocation3 + $0x220] sm:$0xff] }
 0x98a   : > { %v1667_v2 = vpop.f32.mrb[52].mxu1 }
 0x98b   : > { %v1668_v3 = vadd.f32 %v1667_v2, %v1629_v63  ;;  %v3364_v4 = vpop.f32.mrb[53].mxu1  ;;  %v2104_v63 = vld [vmem:[#allocation3 + $0x218] sm:$0xff] }
 0x98c   : > { %v1670_v5 = vpop.f32.mrb[54].mxu1  ;;  %v2273_v2 = vpack.c.bf16 %v2105_v1, %v2104_v63  ;;  %v2106_v4 = vld [vmem:[#allocation3 + $0x228] sm:$0xff]  ;;  %v2406_v63 = vld [vmem:[#allocation3 + $0x298] sm:$0xff]  ;;  %v2407_v1 = vld [vmem:[#allocation3 + $0x2a0] sm:$0xff] }
 0x98d   : > { %v3365_v6 = vpop.f32.mrb[55].mxu1  ;;  %v2107_v5 = vld [vmem:[#allocation3 + $0x230] sm:$0xff] }
 0x992   : > { %v1790_v7 = vpop.f32.mrb[50].mxu1 }
 0x993   : > { %v1794_v8 = vadd.f32 %v1790_v7, %v1668_v3  ;;  %v3376_v9 = vpop.f32.mrb[51].mxu1 }
 0x994   : > { %v2274_v9 = vpack.c.bf16 %v2107_v5, %v2106_v4  ;;  %v2409_v4 = vld [vmem:[#allocation3 + $0x2b0] sm:$0xff] }
 0x995   : > { %vm1795_vm5 = vcmp.ge.f32.partialorder %v1794_v8, 0.0  ;;  %v1796_v12 = vmul.f32 0.2, %v1794_v8 }
 0x997   : > { %v1797_v13 = vsel %vm1795_vm5, %v1794_v8, %v1796_v12 }
 0x998   : > { %v1810_v15 = vpack.c.bf16 %v1797_v13, %v1797_v13 }
 0x99a   : > { %3382 = vmatmul.mubr.msk.bf16.vlgmr.msra.gmra.mrb[48].mxu0 %vm1815_vm11, %v1810_v15 }
 0x99b   : > { %3391 = vmatpush3.bf16.msra.mxu0 %v1811_v14  ;;  %3394 = vmatprep.mubr.msk.bf16.mxu0 %vm3707_vm0, %v3706_v0  ;;  %v2394_v14 = vld [vmem:[#allocation3 + $0x238] sm:$0xff] }
 0x99c   : > { %3392 = vmatprep.subr.bf16.mxu0 %v3706_v0 }
 0x99f   : > { %3393 = vmatpush3.bf16.msra.mxu0 %v1812_v18  ;;  %v2397_v18 = vld [vmem:[#allocation3 + $0x250] sm:$0xff] }
 0x9a0   : > { %3406 = vmatprep.subr.mxu0 %v3706_v0  ;;  %v2424_v19 = vpack.c.bf16 %v2397_v18, %v2396_v16  ;;  %v2718_v16 = vld [vmem:[#allocation3 + $0x320] sm:$0xff]  ;;  %v2720_v18 = vld [vmem:[#allocation3 + $0x330] sm:$0xff] }
 0x9a2   : > { %3395 = vmatmul.mubr.msk.bf16.vlgmr.msra.gmra.mrb[52].mxu0 %vm1815_vm11, %v1810_v15 }
 0x9a3   : > { %3408 = vmatprep.mubr.msk.f32.mxu0 %vm3707_vm0, %v3706_v0 }
 0xa6d   : > { %v1853_v22 = vpop.f32.mrb[48].mxu0 }
 0xa6e   : > { %v3383_v25 = vpop.f32.mrb[49].mxu0  ;;  %3386 = vmatpush3.msk.msra.mxu1 %vm447_vm6, %v1853_v22 }
 0xa6f   : > { %v1856_v26 = vpop.f32.mrb[50].mxu0  ;;  %3388 = vmatmul.mubr.msk.f32.vlgmr.msra.gmra.mrb[56].mxu1 %vm1556_vm4, %v3999_v46  ;;  %3398 = vmatprep.subr.bf16.mxu1 %v3706_v0 }
 0xa70   : > { %v3384_v27 = vpop.f32.mrb[51].mxu0  ;;  %3399 = vmatpush3.bf16.msra.mxu1 %v1972_v21  ;;  %3402 = vmatprep.mubr.msk.bf16.mxu1 %vm3707_vm0, %v3706_v0 }
 0xa71   : > { %3400 = vmatprep.subr.bf16.mxu1 %v3706_v0  ;;  %v2398_v27 = vld [vmem:[#allocation3 + $0x258] sm:$0xff] }
 0xa74   : > { %3401 = vmatpush3.bf16.msra.mxu1 %v1973_v28  ;;  %v2399_v28 = vld [vmem:[#allocation3 + $0x260] sm:$0xff] }
 0xa75   : > { %v1966_v29 = vpop.f32.mrb[52].mxu0  ;;  %3411 = vmatprep.subr.bf16.mxu1 %v3706_v0 }
 0xa76   : > { %v3396_v30 = vpop.f32.mrb[53].mxu0 }
 0xa77   : > { %v1969_v52 = vpop.f32.mrb[54].mxu0  ;;  %3403 = vmatmul.mubr.msk.bf16.vlgmr.msra.gmra.mrb[60].mxu1 %vm1815_vm11, %v1810_v15  ;;  %v2395_v15 = vld [vmem:[#allocation3 + $0x240] sm:$0xff]  ;;  %v2400_v30 = vld [vmem:[#allocation3 + $0x268] sm:$0xff] }
 0xa78   : > { %v3397_v31 = vpop.f32.mrb[55].mxu0  ;;  %3415 = vmatprep.mubr.msk.bf16.mxu1 %vm3707_vm0, %v3706_v0  ;;  %3412 = vmatpush3.bf16.msra.mxu1 %v2111_v44  ;;  %v2423_v17 = vpack.c.bf16 %v2395_v15, %v2394_v14  ;;  %v2401_v52 = vld [vmem:[#allocation3 + $0x270] sm:$0xff]  ;;  %v2717_v15 = vld [vmem:[#allocation3 + $0x318] sm:$0xff] }
 0xa79   : > { %3413 = vmatprep.subr.bf16.mxu1 %v3706_v0  ;;  %v2426_v31 = vpack.c.bf16 %v2401_v52, %v2400_v30  ;;  %v2413_v44 = vld [vmem:[#allocation3 + $0x2d0] sm:$0xff]  ;;  %v2780_v30 = vld [vmem:[#allocation3 + $0x378] sm:$0xff] }
 0xa7a   : > { %v2585_v45 = vpack.c.bf16 %v2413_v44, %v2412_v43 }
 0xa7c   : > { %3414 = vmatpush3.bf16.msra.mxu1 %v2112_v47  ;;  %v2414_v47 = vld [vmem:[#allocation3 + $0x2d8] sm:$0xff] }
 0xa7d   : > { %3424 = vmatprep.subr.bf16.mxu1 %v3706_v0 }
 0xb42   : > { %v1928_v32 = vpop.f32.mrb[56].mxu1 }
 0xb43   : > { %v1967_v33 = vadd.f32 %v1966_v29, %v1928_v32  ;;  %v3389_v34 = vpop.f32.mrb[57].mxu1  ;;  %v2425_v29 = vpack.c.bf16 %v2399_v28, %v2398_v27  ;;  %v2778_v27 = vld [vmem:[#allocation3 + $0x368] sm:$0xff] }
 0xb4a   : > { %v2008_v37 = vpop.f32.mrb[60].mxu1 }
 0xb4b   : > { %v3404_v38 = vpop.f32.mrb[61].mxu1  ;;  %3407 = vmatpush3.msk.msra.mxu0 %vm447_vm6, %v2008_v37  ;;  %v2410_v37 = vld [vmem:[#allocation3 + $0x2b8] sm:$0xff] }
 0xb4c   : > { %v2011_v39 = vpop.f32.mrb[62].mxu1  ;;  %3409 = vmatmul.mubr.msk.f32.vlgmr.msra.gmra.mrb[56].mxu0 %vm1556_vm4, %v4015_v57  ;;  %3419 = vmatprep.subr.mxu0 %v3706_v0  ;;  %v2411_v38 = vld [vmem:[#allocation3 + $0x2c0] sm:$0xff] }
 0xb4d   : > { %v3405_v40 = vpop.f32.mrb[63].mxu1  ;;  %3421 = vmatprep.mubr.msk.f32.mxu0 %vm3707_vm0, %v3706_v0  ;;  %v2584_v41 = vpack.c.bf16 %v2411_v38, %v2410_v37  ;;  %v2784_v37 = vld [vmem:[#allocation3 + $0x398] sm:$0xff] }
 0xc1f   : > { %v2083_v48 = vpop.f32.mrb[56].mxu0 }
 0xc20   : > { %v2087_v49 = vadd.f32 %v2083_v48, %v1967_v33  ;;  %v3410_v50 = vpop.f32.mrb[57].mxu0  ;;  %v2415_v48 = vld [vmem:[#allocation3 + $0x2e0] sm:$0xff] }
 0xc21   : > { %v2416_v50 = vld [vmem:[#allocation3 + $0x2e8] sm:$0xff] }
 0xc22   : > { %vm2088_vm6 = vcmp.ge.f32.partialorder %v2087_v49, 0.0  ;;  %v2089_v35 = vmul.f32 0.2, %v2087_v49 }
 0xc24   : > { %v2090_v51 = vsel %vm2088_vm6, %v2087_v49, %v2089_v35  ;;  %v2586_v49 = vpack.c.bf16 %v2415_v48, %v2414_v47  ;;  %v2417_v35 = vld [vmem:[#allocation3 + $0x2f0] sm:$0xff] }
 0xc25   : > { %2092 = vst.msk [vmem:[#allocation2] sm:$0xf] %vm2091_vm12, %v2090_v51  ;;  %v2587_v51 = vpack.c.bf16 %v2417_v35, %v2416_v50 }
 0xc2c   : > { %v2093_v55 = vld [vmem:[#allocation2] ss:$2 sm:$0x3]  ;;  %v2094_v56 = vld [vmem:[#allocation2 + $0x1] ss:$2 sm:$0x3] }
 0xc2d   : > { %v2095_v36 = vmax.f32 %v2093_v55, %v2094_v56  ;;  %v2419_v55 = vpack.c.bf16 %v2403_v54, %v2402_v53 }
 0xc2f   : > { %v2108_v59 = vpack.c.bf16 %v2095_v36, %v2095_v36  ;;  %v2404_v36 = vld [vmem:[#allocation3 + $0x288] sm:$0xff] }
 0xc31   : > { %3416 = vmatmul.mubr.msk.bf16.vlgmr.msra.gmra.mrb[64].mxu1 %vm1815_vm11, %v2108_v59 }
 0xc32   : > { %3425 = vmatpush3.bf16.msra.mxu1 %v2109_v58  ;;  %3428 = vmatprep.mubr.msk.bf16.mxu1 %vm3707_vm0, %v3706_v0  ;;  %v2405_v58 = vld [vmem:[#allocation3 + $0x290] sm:$0xff] }
 0xc33   : > { %3426 = vmatprep.subr.bf16.mxu1 %v3706_v0 }
 0xc36   : > { %3427 = vmatpush3.bf16.msra.mxu1 %v2110_v62  ;;  %v2420_v62 = vpack.c.bf16 %v2405_v58, %v2404_v36 }
 0xc37   : > { %3440 = vmatprep.subr.mxu1 %v3706_v0 }
 0xc39   : > { %3429 = vmatmul.mubr.msk.bf16.vlgmr.msra.gmra.mrb[68].mxu1 %vm1815_vm11, %v2108_v59 }
 0xc3a   : > { %3442 = vmatprep.mubr.msk.f32.mxu1 %vm3707_vm0, %v3706_v0 }
 0xd04   : > { %v2150_v3 = vpop.f32.mrb[64].mxu1 }
 0xd05   : > { %v3417_v6 = vpop.f32.mrb[65].mxu1  ;;  %3420 = vmatpush3.msk.msra.mxu0 %vm2159_vm9, %v2150_v3  ;;  %v2408_v3 = vld [vmem:[#allocation3 + $0x2a8] sm:$0xff] }
 0xd06   : > { %v2153_v7 = vpop.f32.mrb[66].mxu1  ;;  %3422 = vmatmul.mubr.msk.f32.vlgmr.msra.gmra.mrb[58].mxu0 %vm2156_vm10, %v3999_v46  ;;  %3432 = vmatprep.subr.bf16.mxu0 %v3706_v0  ;;  %v2422_v5 = vpack.c.bf16 %v2409_v4, %v2408_v3  ;;  %v2842_v3 = vld [vmem:[#allocation3 + $0x3c8] sm:$0xff]  ;;  %v2843_v4 = vld [vmem:[#allocation3 + $0x3d0] sm:$0xff] }
 0xd07   : > { %v3418_v8 = vpop.f32.mrb[67].mxu1  ;;  %3433 = vmatpush3.bf16.msra.mxu0 %v2273_v2  ;;  %3436 = vmatprep.mubr.msk.bf16.mxu0 %vm3707_vm0, %v3706_v0  ;;  %v2421_v2 = vpack.c.bf16 %v2407_v1, %v2406_v63  ;;  %v2787_v63 = vld [vmem:[#allocation3 + $0x3b0] sm:$0xff]  ;;  %v2788_v1 = vld [vmem:[#allocation3 + $0x3b8] sm:$0xff] }
 0xd08   : > { %3434 = vmatprep.subr.bf16.mxu0 %v3706_v0 }
 0xd0b   : > { %3435 = vmatpush3.bf16.msra.mxu0 %v2274_v9  ;;  %v2713_v9 = vld [vmem:[#allocation3 + $0x2f8] sm:$0xff] }
 0xd0c   : > { %v2267_v10 = vpop.f32.mrb[68].mxu1  ;;  %3445 = vmatprep.subr.bf16.mxu0 %v3706_v0 }
 0xd0d   : > { %v3430_v11 = vpop.f32.mrb[69].mxu1 }
 0xd0e   : > { %v2270_v12 = vpop.f32.mrb[70].mxu1  ;;  %3437 = vmatmul.mubr.msk.bf16.vlgmr.msra.gmra.mrb[60].mxu0 %vm1815_vm11, %v2108_v59 }
 0xd0f   : > { %v3431_v13 = vpop.f32.mrb[71].mxu1  ;;  %3453 = vmatprep.mubr.msk.bf16.mxu0 %vm3707_vm0, %v3706_v0  ;;  %3446 = vmatpush3.bf16.msra.mxu0 %v2423_v17  ;;  %v2715_v12 = vld [vmem:[#allocation3 + $0x308] sm:$0xff]  ;;  %v2724_v17 = vpack.c.bf16 %v2718_v16, %v2717_v15  ;;  %v2851_v15 = vld [vmem:[#allocation3 + $0x410] sm:$0xff] }
 0xd10   : > { %3447 = vmatprep.subr.bf16.mxu0 %v3706_v0  ;;  %v2716_v13 = vld [vmem:[#allocation3 + $0x310] sm:$0xff] }
 0xd11   : > { %v2723_v14 = vpack.c.bf16 %v2716_v13, %v2715_v12  ;;  %v2849_v12 = vld [vmem:[#allocation3 + $0x400] sm:$0xff] }
 0xd13   : > { %3448 = vmatpush3.bf16.msra.mxu0 %v2424_v19 }
 0xd14   : > { %3449 = vmatprep.subr.bf16.mxu0 %v3706_v0 }
 0xd17   : > { %3450 = vmatpush3.bf16.msra.mxu0 %v2425_v29  ;;  %v2779_v29 = vld [vmem:[#allocation3 + $0x370] sm:$0xff] }
 0xd18   : > { %3451 = vmatprep.subr.bf16.mxu0 %v3706_v0  ;;  %v2793_v52 = vpack.c.bf16 %v2780_v30, %v2779_v29  ;;  %v2855_v29 = vld [vmem:[#allocation3 + $0x430] sm:$0xff] }
 0xd1b   : > { %3452 = vmatpush3.bf16.msra.mxu0 %v2426_v31  ;;  %v2781_v31 = vld [vmem:[#allocation3 + $0x380] sm:$0xff] }
 0xd1c   : > { %3474 = vmatprep.subr.bf16.mxu0 %v3706_v0 }
 0xdd9   : > { %v2229_v20 = vpop.f32.mrb[58].mxu0 }
 0xdda   : > { %v2268_v21 = vadd.f32 %v2267_v10, %v2229_v20  ;;  %v3423_v22 = vpop.f32.mrb[59].mxu0  ;;  %v2714_v10 = vld [vmem:[#allocation3 + $0x300] sm:$0xff] }
 0xddb   : > { %v2722_v11 = vpack.c.bf16 %v2714_v10, %v2713_v9  ;;  %v2773_v20 = vld [vmem:[#allocation3 + $0x340] sm:$0xff]  ;;  %v2775_v22 = vld [vmem:[#allocation3 + $0x350] sm:$0xff] }
 0xddc   : > { %v2847_v9 = vld [vmem:[#allocation3 + $0x3f0] sm:$0xff] }
 0xde1   : > { %v2309_v23 = vpop.f32.mrb[60].mxu0 }
 0xde2   : > { %v3438_v24 = vpop.f32.mrb[61].mxu0  ;;  %3441 = vmatpush3.msk.msra.mxu1 %vm2159_vm9, %v2309_v23 }
 0xde3   : > { %v2312_v25 = vpop.f32.mrb[62].mxu0  ;;  %3443 = vmatmul.mubr.msk.f32.vlgmr.msra.gmra.mrb[58].mxu1 %vm2156_vm10, %v4015_v57  ;;  %3457 = vmatprep.subr.mxu1 %v3706_v0  ;;  %v2776_v24 = vld [vmem:[#allocation3 + $0x358] sm:$0xff] }
 0xde4   : > { %v3439_v26 = vpop.f32.mrb[63].mxu0  ;;  %3459 = vmatprep.mubr.msk.f32.mxu1 %vm3707_vm0, %v3706_v0  ;;  %v2791_v25 = vpack.c.bf16 %v2776_v24, %v2775_v22 }
 0xde5   : > { %v2777_v26 = vld [vmem:[#allocation3 + $0x360] sm:$0xff] }
 0xde6   : > { %v2792_v28 = vpack.c.bf16 %v2778_v27, %v2777_v26 }
 0xeb6   : > { %v2386_v32 = vpop.f32.mrb[58].mxu1 }
 0xeb7   : > { %v2390_v33 = vadd.f32 %v2386_v32, %v2268_v21  ;;  %v3444_v34 = vpop.f32.mrb[59].mxu1  ;;  %v2774_v21 = vld [vmem:[#allocation3 + $0x348] sm:$0xff] }
 0xeb8   : > { %v2790_v23 = vpack.c.bf16 %v2774_v21, %v2773_v20  ;;  %v2782_v32 = vld [vmem:[#allocation3 + $0x388] sm:$0xff]  ;;  %v2783_v34 = vld [vmem:[#allocation3 + $0x390] sm:$0xff] }
 0xeb9   : > { %vm2391_vm13 = vcmp.ge.f32.partialorder %v2390_v33, 0.0  ;;  %v2392_v39 = vmul.f32 0.2, %v2390_v33  ;;  %v2795_v38 = vpack.c.bf16 %v2784_v37, %v2783_v34 }
 0xebb   : > { %v2393_v40 = vsel %vm2391_vm13, %v2390_v33, %v2392_v39  ;;  %v2794_v33 = vpack.c.bf16 %v2782_v32, %v2781_v31  ;;  %v2857_v31 = vld [vmem:[#allocation3 + $0x440] sm:$0xff] }
 0xebc   : > { %v2418_v42 = vpack.c.bf16 %v2393_v40, %v2393_v40 }
 0xebe   : > { %3454 = vmatmul.mubr.msk.bf16.vlgmr.msra.gmra.mrb[64].mxu0 %vm2427_vm15, %v2418_v42 }
 0xebf   : > { %3475 = vmatpush3.bf16.msra.mxu0 %v2584_v41  ;;  %3482 = vmatprep.mubr.msk.bf16.mxu0 %vm3707_vm0, %v3706_v0 }
 0xec0   : > { %3476 = vmatprep.subr.bf16.mxu0 %v3706_v0 }
 0xec3   : > { %3477 = vmatpush3.bf16.msra.mxu0 %v2585_v45 }
 0xec4   : > { %3478 = vmatprep.subr.bf16.mxu0 %v3706_v0 }
 0xec7   : > { %3479 = vmatpush3.bf16.msra.mxu0 %v2586_v49 }
 0xec8   : > { %3480 = vmatprep.subr.bf16.mxu0 %v3706_v0 }
 0xecb   : > { %3481 = vmatpush3.bf16.msra.mxu0 %v2587_v51 }
 0xecc   : > { %3491 = vmatprep.subr.bf16.mxu0 %v3706_v0 }
 0xece   : > { %3483 = vmatmul.mubr.msk.bf16.vlgmr.msra.gmra.mrb[68].mxu0 %vm2427_vm15, %v2418_v42 }
 0xecf   : > { %3499 = vmatprep.mubr.msk.bf16.mxu0 %vm3707_vm0, %v3706_v0  ;;  %3492 = vmatpush3.bf16.msra.mxu0 %v2722_v11  ;;  %v2848_v11 = vld [vmem:[#allocation3 + $0x3f8] sm:$0xff] }
 0xed0   : > { %3493 = vmatprep.subr.bf16.mxu0 %v3706_v0  ;;  %v2862_v13 = vpack.c.bf16 %v2849_v12, %v2848_v11 }
 0xed3   : > { %3494 = vmatpush3.bf16.msra.mxu0 %v2723_v14  ;;  %v2850_v14 = vld [vmem:[#allocation3 + $0x408] sm:$0xff] }
 0xed4   : > { %3495 = vmatprep.subr.bf16.mxu0 %v3706_v0  ;;  %v2863_v16 = vpack.c.bf16 %v2851_v15, %v2850_v14 }
 0xed7   : > { %3496 = vmatpush3.bf16.msra.mxu0 %v2724_v17  ;;  %v2852_v17 = vld [vmem:[#allocation3 + $0x418] sm:$0xff] }
 0xed8   : > { %3497 = vmatprep.subr.bf16.mxu0 %v3706_v0 }
 0xf91   : > { %v2465_v56 = vpop.f32.mrb[64].mxu0 }
 0xf92   : > { %v3455_v59 = vpop.f32.mrb[65].mxu0  ;;  %3458 = vmatpush3.msk.msra.mxu1 %vm2159_vm9, %v2465_v56 }
 0xf93   : > { %v2468_v60 = vpop.f32.mrb[66].mxu0  ;;  %3462 = vmatprep.subr.bf16.mxu1 %v3706_v0  ;;  %3460 = vmatmul.mubr.msk.f32.vlgmr.msra.gmra.mrb[72].mxu1 %vm2156_vm10, %v3999_v46 }
 0xf94   : > { %v3456_v61 = vpop.f32.mrb[67].mxu0  ;;  %3463 = vmatpush3.bf16.msra.mxu1 %v2419_v55  ;;  %3470 = vmatprep.mubr.msk.bf16.mxu1 %vm3707_vm0, %v3706_v0  ;;  %v2785_v60 = vld [vmem:[#allocation3 + $0x3a0] sm:$0xff] }
 0xf95   : > { %3464 = vmatprep.subr.bf16.mxu1 %v3706_v0  ;;  %v2786_v61 = vld [vmem:[#allocation3 + $0x3a8] sm:$0xff] }
 0xf98   : > { %3465 = vmatpush3.bf16.msra.mxu1 %v2420_v62  ;;  %v2796_v62 = vpack.c.bf16 %v2786_v61, %v2785_v60 }
 0xf99   : > { %3466 = vmatprep.subr.bf16.mxu1 %v3706_v0 }
 0xf9c   : > { %3467 = vmatpush3.bf16.msra.mxu1 %v2421_v2  ;;  %v2797_v2 = vpack.c.bf16 %v2788_v1, %v2787_v63 }
 0xf9d   : > { %3468 = vmatprep.subr.bf16.mxu1 %v3706_v0 }
 0xfa0   : > { %3469 = vmatpush3.bf16.msra.mxu1 %v2422_v5  ;;  %v2844_v5 = vld [vmem:[#allocation3 + $0x3d8] sm:$0xff] }
 0xfa1   : > { %v2622_v46 = vpop.f32.mrb[68].mxu0  ;;  %3486 = vmatprep.subr.mxu1 %v3706_v0 }
 0xfa2   : > { %v3484_v6 = vpop.f32.mrb[69].mxu0 }
 0xfa3   : > { %v2625_v7 = vpop.f32.mrb[70].mxu0  ;;  %3471 = vmatmul.mubr.msk.bf16.vlgmr.msra.gmra.mrb[76].mxu1 %vm2427_vm15, %v2418_v42  ;;  %v2845_v6 = vld [vmem:[#allocation3 + $0x3e0] sm:$0xff] }
 0xfa4   : > { %v3485_v8 = vpop.f32.mrb[71].mxu0  ;;  %3487 = vmatpush3.msk.msra.mxu1 %vm2159_vm9, %v2622_v46  ;;  %3488 = vmatprep.mubr.msk.f32.mxu1 %vm3707_vm0, %v3706_v0  ;;  %v2859_v46 = vpack.c.bf16 %v2843_v4, %v2842_v3  ;;  %v2860_v7 = vpack.c.bf16 %v2845_v6, %v2844_v5 }
 0xfa5   : > { %3503 = vmatprep.subr.bf16.mxu1 %v3706_v0  ;;  %v2846_v8 = vld [vmem:[#allocation3 + $0x3e8] sm:$0xff] }
 0xfa6   : > { %v2861_v10 = vpack.c.bf16 %v2847_v9, %v2846_v8 }
 0xfab   : > { %3489 = vmatmul.mubr.msk.f32.vlgmr.msra.gmra.mrb[74].mxu1 %vm2156_vm10, %v4015_v57  ;;  %v2719_v57 = vld [vmem:[#allocation3 + $0x328] sm:$0xff] }
 0xfac   : > { %3519 = vmatprep.mubr.msk.bf16.mxu1 %vm3707_vm0, %v3706_v0  ;;  %v2725_v19 = vpack.c.bf16 %v2720_v18, %v2719_v57  ;;  %3504 = vmatpush3.bf16.msra.mxu1 %v2790_v23  ;;  %v2853_v57 = vld [vmem:[#allocation3 + $0x420] sm:$0xff] }
 0xfad   : > { %3505 = vmatprep.subr.bf16.mxu1 %v3706_v0  ;;  %v2864_v18 = vpack.c.bf16 %v2853_v57, %v2852_v17 }
 0xfae   : > { %3498 = vmatpush3.bf16.msra.mxu0 %v2725_v19  ;;  %v2726_v19 = vld [vmem:[#allocation3 + $0x338] sm:$0x1] }
 0xfaf   : > { %3523 = vmatprep.subr.bf16.mxu0 %v3706_v0 }
 0xfb0   : > { %3506 = vmatpush3.bf16.msra.mxu1 %v2791_v25 }
 0xfb1   : > { %3507 = vmatprep.subr.bf16.mxu1 %v3706_v0 }
 0xfb4   : > { %3508 = vmatpush3.bf16.msra.mxu1 %v2792_v28  ;;  %v2854_v28 = vld [vmem:[#allocation3 + $0x428] sm:$0xff] }
 0xfb5   : > { %3509 = vmatprep.subr.bf16.mxu1 %v3706_v0  ;;  %v2865_v30 = vpack.c.bf16 %v2855_v29, %v2854_v28 }
 0xfb8   : > { %3510 = vmatpush3.bf16.msra.mxu1 %v2793_v52  ;;  %v2856_v52 = vld [vmem:[#allocation3 + $0x438] sm:$0xff] }
 0xfb9   : > { %3511 = vmatprep.subr.bf16.mxu1 %v3706_v0  ;;  %v2866_v32 = vpack.c.bf16 %v2857_v31, %v2856_v52 }
 0xfbc   : > { %3512 = vmatpush3.bf16.msra.mxu1 %v2794_v33  ;;  %v2798_v33 = vld [vmem:[#allocation3 + $0x3c0] sm:$0x1] }
 0xfbd   : > { %3513 = vmatprep.subr.bf16.mxu1 %v3706_v0 }
 0xfc0   : > { %3514 = vmatpush3.bf16.msra.mxu1 %v2795_v38 }
 0xfc1   : > { %3515 = vmatprep.subr.bf16.mxu1 %v3706_v0 }
 0xfc4   : > { %3516 = vmatpush3.bf16.msra.mxu1 %v2796_v62 }
 0xfc5   : > { %3517 = vmatprep.subr.bf16.mxu1 %v3706_v0 }
 0xfc8   : > { %3518 = vmatpush3.bf16.msra.mxu1 %v2797_v2 }
0x1066   : > { %v2540_v39 = vpop.f32.mrb[72].mxu1 }
0x1067   : > { %v3461_v40 = vpop.f32.mrb[73].mxu1 }
0x1076   : > { %v2578_v41 = vpop.f32.mrb[76].mxu1 }
0x1077   : > { %v2579_v42 = vadd.f32 %v2578_v41, %v2540_v39  ;;  %v3472_v43 = vpop.f32.mrb[77].mxu1 }
0x1078   : > { %v2581_v44 = vpop.f32.mrb[78].mxu1 }
0x1079   : > { %v3473_v45 = vpop.f32.mrb[79].mxu1  ;;  %v2867_v44 = vld [vmem:[#allocation3 + $0x448] sm:$0x1] }
0x107e   : > { %v2697_v47 = vpop.f32.mrb[74].mxu1 }
0x107f   : > { %v2701_v48 = vadd.f32 %v2697_v47, %v2579_v42  ;;  %v3490_v49 = vpop.f32.mrb[75].mxu1 }
0x1081   : > { %vm2702_vm1 = vcmp.ge.f32.partialorder %v2701_v48, 0.0  ;;  %v2703_v50 = vmul.f32 0.2, %v2701_v48 }
0x1083   : > { %v2704_v35 = vsel %vm2702_vm1, %v2701_v48, %v2703_v50 }
0x1084   : > { %v2706_v51 = vsel %vm2705_vm2, %v2704_v35, -inf }
0x1085   : > { %v2707_v53 = vrot.slane %v2706_v51, 4 }
0x1087   : > { %v2708_v54 = vmax.f32 %v2706_v51, %v2707_v53 }
0x1089   : > { %v2709_v55 = vrot.slane %v2708_v54, 2 }
0x108b   : > { %v2710_v56 = vmax.f32 %v2708_v54, %v2709_v55 }
0x108d   : > { %v2711_v36 = vrot.slane %v2710_v56, 1 }
0x108f   : > { %v2712_v58 = vmax.f32 %v2710_v56, %v2711_v36 }
0x1091   : > { %v2721_v59 = vpack.c.bf16 %v2712_v58, %v2712_v58 }
0x1093   : > { %3500 = vmatmul.mubr.msk.bf16.vlgmr.msra.gmra.mrb[72].mxu0 %vm2427_vm15, %v2721_v59 }
0x1094   : > { %3539 = vmatprep.mubr.msk.bf16.mxu0 %vm3707_vm0, %v3706_v0  ;;  %3524 = vmatpush3.bf16.msra.mxu0 %v2859_v46 }
0x1095   : > { %3525 = vmatprep.subr.bf16.mxu0 %v3706_v0 }
0x1098   : > { %3526 = vmatpush3.bf16.msra.mxu0 %v2860_v7 }
0x1099   : > { %3527 = vmatprep.subr.bf16.mxu0 %v3706_v0 }
0x109c   : > { %3528 = vmatpush3.bf16.msra.mxu0 %v2861_v10 }
0x109d   : > { %3529 = vmatprep.subr.bf16.mxu0 %v3706_v0 }
0x10a0   : > { %3530 = vmatpush3.bf16.msra.mxu0 %v2862_v13 }
0x10a1   : > { %3531 = vmatprep.subr.bf16.mxu0 %v3706_v0 }
0x10a4   : > { %3532 = vmatpush3.bf16.msra.mxu0 %v2863_v16 }
0x10a5   : > { %3533 = vmatprep.subr.bf16.mxu0 %v3706_v0 }
0x10a8   : > { %3534 = vmatpush3.bf16.msra.mxu0 %v2864_v18 }
0x10a9   : > { %3535 = vmatprep.subr.bf16.mxu0 %v3706_v0 }
0x10ac   : > { %3536 = vmatpush3.bf16.msra.mxu0 %v2865_v30 }
0x10ad   : > { %3537 = vmatprep.subr.bf16.mxu0 %v3706_v0 }
0x10b0   : > { %3538 = vmatpush3.bf16.msra.mxu0 %v2866_v32 }
0x1166   : > { %v2764_v20 = vpop.f32.mrb[72].mxu0 }
0x1167   : > { %v2765_v21 = vadd.f32 %v2764_v20, %v2726_v19  ;;  %v3501_v22 = vpop.f32.mrb[73].mxu0 }
0x1168   : > { %v2767_v23 = vpop.f32.mrb[74].mxu0 }
0x1169   : > { %vm2770_vm0 = vcmp.ge.f32.partialorder %v2765_v21, 0.0  ;;  %v2771_v24 = vmul.f32 0.2, %v2765_v21  ;;  %v3502_v25 = vpop.f32.mrb[75].mxu0 }
0x116b   : > { %v2772_v26 = vsel %vm2770_vm0, %v2765_v21, %v2771_v24 }
0x116c   : > { %v2789_v27 = vpack.c.bf16 %v2772_v26, %v2772_v26 }
0x116e   : > { %3520 = vmatmul.mubr.bf16.vlgmr.msra.gmra.mrb[80].mxu1 %v2789_v27 }
0x1241   : > { %v2833_v34 = vpop.f32.mrb[80].mxu1 }
0x1242   : > { %v2834_v37 = vadd.f32 %v2833_v34, %v2798_v33  ;;  %v3521_v38 = vpop.f32.mrb[81].mxu1 }
0x1243   : > { %v2836_v39 = vpop.f32.mrb[82].mxu1 }
0x1244   : > { %vm2839_vm14 = vcmp.ge.f32.partialorder %v2834_v37, 0.0  ;;  %v2840_v40 = vmul.f32 0.2, %v2834_v37  ;;  %v3522_v41 = vpop.f32.mrb[83].mxu1 }
0x1246   : > { %v2841_v42 = vsel %vm2839_vm14, %v2834_v37, %v2840_v40 }
0x1247   : > { %v2858_v43 = vpack.c.bf16 %v2841_v42, %v2841_v42 }
0x1249   : > { %3540 = vmatmul.mubr.bf16.vlgmr.msra.gmra.mrb[76].mxu0 %v2858_v43 }
0x131c   : > { %v2902_v0 = vpop.f32.mrb[76].mxu0 }
0x131d   : > { %v2903_v45 = vadd.f32 %v2902_v0, %v2867_v44  ;;  %v3541_v47 = vpop.f32.mrb[77].mxu0 }
0x131e   : > { %v2905_v48 = vpop.f32.mrb[78].mxu0 }
0x131f   : > { %v3542_v49 = vpop.f32.mrb[79].mxu0  ;;  %2909 = vst.msk [vmem:[%s192_s7] sm:$0x1] %vm2908_vm3, %v2903_v45 }
0x1320   : > { %3648 = shalt.err (!%p3645_p7)
}
0x1321   : > { %s3649_s25 = scalar_lea.hbm %s4134_s11, 16  ;;  %s3653_s28 = scalar_lea.hbm %s4179_s3, 32 }
0x1322   : > { %p3650_p8 = scmp.ne.s32.totalorder %s4134_s11, %s3649_s25  ;;  %p3654_p1 = scmp.lt.u32.totalorder %s4134_s11, %s4179_s3 }
0x1323   : > { %p3655_p0 = scmp.lt.u32.totalorder %s3653_s28, %s3649_s25  ;;  %p3657_p6 = scmp.lt.u32.totalorder %s3649_s25, %s4134_s11 }
0x1324   : > { %p3651_p11 = pnand %p3650_p8, %p4190_p9 }
0x1325   : > { %p3656_p5 = por %p3655_p0, %p3654_p1 }
0x1326   : > { %p3652_p13 = pneg %p3651_p11 }
0x1327   : > { %p3658_p10 = por %p3657_p6, %p3656_p5 }
0x1329   : > { %p3659_p12 = pnand %p3658_p10, %p3652_p13 }
0x132b   : > { %3662 = shalt.err (!%p3659_p12)
}
0x132c   : > { %3554 = dma.vmem_to_hbm [thread:$0]  (%p4190_p9), %s4136_s8, 16, %s4134_s11, %s2911_s16  }
0x132d PF: > { %p3566_p2 = scmp.ge.s32.totalorder %s3701_s15, 2  ;;  %s2935_s4 = sand.u32 1, %s3689_s12  }
0x132e   : > { %p4191_p3 = scmp.ne.s32.totalorder %s4184_s23, 0  ;;  %s2936_s5 = scalar_lea.sflag [#allocation5], %s2935_s4 }
0x1330   : > { %p3561_p4 = pnand %p3566_p2, %p4191_p3 }
0x1332   : > { %3684 = dma.done.wait (!%p3561_p4), %s2936_s5, 16  }
0x1333   : > { %3686 = vsyncadd (!%p3561_p4), %s2936_s5, 4294967280  ;;  %p14_p7 = scmp.ge.s32.totalorder %s3757_s18, 4   ;;  %s4192_s12 = smov %s3693_s13 }
0x1334   : > { %s4193_s13 = smov %s3697_s14  ;;  %s4194_s14 = smov %s3768_s21 }
0x1335   : > { %s4195_s15 = smov %s3757_s18  ;;  %16 = sbr.rel (!%p14_p7) target bundleno = 4 (0x4), region = 76 }
0x133c   :  { %2940 = vsyncpa [#allocation4], 1 }
0x133d   :  { %2942 = vsyncpa [#allocation4 + $0x1], 1 }
0x133e   :  { %2943 = vsyncpa [#allocation5], 1 }
0x133f   :  { %2945 = vsyncpa [#allocation5 + $0x1], 1 }

</bundles_post_ra>
